<compile_context>
chip_gen: v7x
topology: tpu7x:2x2x1
jax: 0.10.0
libtpu: 0.0.40
codegen_flags: <defaults>
</compile_context>

<pallas_src>
import math

import jax
import jax.numpy as jnp
from jax.experimental import pallas as pl
from jax.experimental.pallas import tpu as pltpu

# ----------------------------- config (small BERT-like) -----------------------------
VOCAB = 100
MAX_POS = 32
TYPE_VOCAB = 2
HIDDEN = 128
NUM_HEADS = 4
HEAD_DIM = HIDDEN // NUM_HEADS
FFN = 256
NUM_LAYERS = 2
OUTPUT_SIZE = 7          # len(train_label_mapping) distinct labels == 7? (mapping has 7 keys)
O_PAD = 128              # lane-dense padded classifier width
LN_EPS = 1e-12
SCALE = 1.0 / math.sqrt(HEAD_DIM)
MATMUL_DTYPE = jnp.bfloat16   # MXU input dtype (f32 accumulate)


# --------------------------------- fused Pallas kernel -------------------------------
def _layernorm(h, gamma, beta):
    # one-pass mean / variance (E[x^2] - mu^2), all in f32
    mu = jnp.mean(h, axis=-1, keepdims=True)
    var = jnp.maximum(jnp.mean(h * h, axis=-1, keepdims=True) - mu * mu, 0.0)
    return (h - mu) * jax.lax.rsqrt(var + LN_EPS) * gamma + beta


def _encoder_kernel(
    we_ref, pe_ref, te_ref, mask_ref, emb_g_ref, emb_b_ref,
    wqkv_ref, bqkv_ref, wo_ref, bo_ref, ln1_g_ref, ln1_b_ref,
    w1_ref, b1_ref, w2_ref, b2_ref, ln2_g_ref, ln2_b_ref,
    wp_ref, bp_ref, wc_ref, bc_ref,
    logits_ref,
    x_scr,
):
    l = pl.program_id(1)

    # ---- layer-0 prologue: embedding sum + LayerNorm into the resident VMEM slab ----
    @pl.when(l == 0)
    def _():
        h = we_ref[0] + pe_ref[...] + te_ref[...]          # (S,H) + (S,H) + (1,H)
        x_scr[...] = _layernorm(h, emb_g_ref[...], emb_b_ref[...])

    x = x_scr[...]                                         # (S, H) float32

    # ---- multi-head self-attention (fused QKV projection, heads sliced in-kernel) ----
    qkv = jnp.dot(x.astype(MATMUL_DTYPE), wqkv_ref[0],
                  preferred_element_type=jnp.float32) + bqkv_ref[0]   # (S, 3H) f32
    mask_bias = (mask_ref[0] - 1.0) * 1e9                  # (1, S): 0 keep, -1e9 masked

    ctx_heads = []
    for hidx in range(NUM_HEADS):
        lo = hidx * HEAD_DIM
        q_h = qkv[:, lo:lo + HEAD_DIM].astype(MATMUL_DTYPE)
        k_h = qkv[:, HIDDEN + lo:HIDDEN + lo + HEAD_DIM].astype(MATMUL_DTYPE)
        v_h = qkv[:, 2 * HIDDEN + lo:2 * HIDDEN + lo + HEAD_DIM].astype(MATMUL_DTYPE)
        # scores: contract head_dim of q and k (no explicit transpose needed)
        s = jax.lax.dot_general(q_h, k_h, (((1,), (1,)), ((), ())),
                                preferred_element_type=jnp.float32) * SCALE
        s = s + mask_bias
        s = s - jnp.max(s, axis=-1, keepdims=True)
        p = jnp.exp(s)
        p = p * pl.reciprocal(jnp.sum(p, axis=-1, keepdims=True), approx=True)
        ctx_heads.append(jnp.dot(p.astype(MATMUL_DTYPE), v_h,
                                 preferred_element_type=jnp.float32))
    ctx = jnp.concatenate(ctx_heads, axis=-1)              # (S, H)

    attn_out = jnp.dot(ctx.astype(MATMUL_DTYPE), wo_ref[0],
                       preferred_element_type=jnp.float32) + bo_ref[0]
    # hidden dropout is identity at inference
    x = _layernorm(attn_out + x, ln1_g_ref[0], ln1_b_ref[0])

    # ---- feed-forward (GELU) ----
    h1 = jnp.dot(x.astype(MATMUL_DTYPE), w1_ref[0],
                 preferred_element_type=jnp.float32) + b1_ref[0]
    # TODO(synk): HF BERT uses exact erf-GELU by default; tanh approximation differs ~1e-3.
    h1 = jax.nn.gelu(h1, approximate=True)
    ffn_out = jnp.dot(h1.astype(MATMUL_DTYPE), w2_ref[0],
                      preferred_element_type=jnp.float32) + b2_ref[0]
    x = _layernorm(ffn_out + x, ln2_g_ref[0], ln2_b_ref[0])
    x_scr[...] = x

    # ---- last-layer epilogue: pooler(tanh) -> Dropout(0.2)=identity -> classifier ----
    @pl.when(l == pl.num_programs(1) - 1)
    def _():
        pooled = jnp.tanh(
            jnp.dot(x.astype(MATMUL_DTYPE), wp_ref[...],
                    preferred_element_type=jnp.float32) + bp_ref[...])   # (S, H)
        # classifier into a lane-dense (S, 128) slab; wrapper keeps row 0 (CLS), cols [:7]
        logits_ref[0] = (jnp.dot(pooled.astype(MATMUL_DTYPE), wc_ref[...],
                                 preferred_element_type=jnp.float32) + bc_ref[...])


# ------------------------------ parameter initialization -----------------------------
def init_params(key):
    def nrm(k, shape, scale=0.02, dtype=jnp.float32):
        return (scale * jax.random.normal(k, shape)).astype(dtype)

    ks = jax.random.split(key, 9)
    L, H, F, O = NUM_LAYERS, HIDDEN, FFN, OUTPUT_SIZE
    cls_w = jnp.zeros((H, O_PAD), jnp.float32).at[:, :O].set(nrm(ks[8], (H, O)))
    return {
        "word_emb": nrm(ks[0], (VOCAB, H)),
        "pos_emb": nrm(ks[1], (MAX_POS, H)),
        "type_emb": nrm(ks[2], (TYPE_VOCAB, H)),
        "emb_ln_g": jnp.ones((1, H), jnp.float32),
        "emb_ln_b": jnp.zeros((1, H), jnp.float32),
        # encoder weights stacked on a leading layer axis; matmul weights in bf16
        "wqkv": nrm(ks[3], (L, H, 3 * H), dtype=MATMUL_DTYPE),
        "bqkv": jnp.zeros((L, 1, 3 * H), jnp.float32),
        "wo": nrm(ks[4], (L, H, H), dtype=MATMUL_DTYPE),
        "bo": jnp.zeros((L, 1, H), jnp.float32),
        "ln1_g": jnp.ones((L, 1, H), jnp.float32),
        "ln1_b": jnp.zeros((L, 1, H), jnp.float32),
        "w1": nrm(ks[5], (L, H, F), dtype=MATMUL_DTYPE),
        "b1": jnp.zeros((L, 1, F), jnp.float32),
        "w2": nrm(ks[6], (L, F, H), dtype=MATMUL_DTYPE),
        "b2": jnp.zeros((L, 1, H), jnp.float32),
        "ln2_g": jnp.ones((L, 1, H), jnp.float32),
        "ln2_b": jnp.zeros((L, 1, H), jnp.float32),
        # pooler + classifier (classifier padded to lane-dense 128 columns)
        "pooler_w": nrm(ks[7], (H, H), dtype=MATMUL_DTYPE),
        "pooler_b": jnp.zeros((1, H), jnp.float32),
        "cls_w": cls_w.astype(MATMUL_DTYPE),
        "cls_b": jnp.zeros((1, O_PAD), jnp.float32),
    }


# ----------------------------------- forward pass ------------------------------------
def bert_classifier_forward(params, input_ids, attention_mask):
    B, S = input_ids.shape
    H, F, L = HIDDEN, FFN, NUM_LAYERS

    # embedding row gather stays in plain JAX (data-dependent gather)
    we = jnp.take(params["word_emb"], input_ids, axis=0)           # (B, S, H)
    pe = params["pos_emb"][:S]                                     # (S, H)
    te = params["type_emb"][0:1]                                   # (1, H) token_type=0
    mask = attention_mask.astype(jnp.float32).reshape(B, 1, S)     # (B, 1, S)

    const2 = lambda b, l: (0, 0)
    const3 = lambda b, l: (0, 0, 0)
    per_layer = lambda b, l: (l, 0, 0)
    per_batch = lambda b, l: (b, 0, 0)

    in_specs = [
        pl.BlockSpec((1, S, H), per_batch),         # we
        pl.BlockSpec((S, H), const2),               # pe
        pl.BlockSpec((1, H), const2),               # te
        pl.BlockSpec((1, 1, S), per_batch),         # mask
        pl.BlockSpec((1, H), const2),               # emb_ln_g
        pl.BlockSpec((1, H), const2),               # emb_ln_b
        pl.BlockSpec((1, H, 3 * H), per_layer),     # wqkv
        pl.BlockSpec((1, 1, 3 * H), per_layer),     # bqkv
        pl.BlockSpec((1, H, H), per_layer),         # wo
        pl.BlockSpec((1, 1, H), per_layer),         # bo
        pl.BlockSpec((1, 1, H), per_layer),         # ln1_g
        pl.BlockSpec((1, 1, H), per_layer),         # ln1_b
        pl.BlockSpec((1, H, F), per_layer),         # w1
        pl.BlockSpec((1, 1, F), per_layer),         # b1
        pl.BlockSpec((1, F, H), per_layer),         # w2
        pl.BlockSpec((1, 1, H), per_layer),         # b2
        pl.BlockSpec((1, 1, H), per_layer),         # ln2_g
        pl.BlockSpec((1, 1, H), per_layer),         # ln2_b
        pl.BlockSpec((H, H), const2),               # pooler_w
        pl.BlockSpec((1, H), const2),               # pooler_b
        pl.BlockSpec((H, O_PAD), const2),           # cls_w (padded)
        pl.BlockSpec((1, O_PAD), const2),           # cls_b (padded)
    ]

    logits_pad = pl.pallas_call(
        _encoder_kernel,
        out_shape=jax.ShapeDtypeStruct((B, S, O_PAD), jnp.float32),
        grid=(B, L),
        in_specs=in_specs,
        out_specs=pl.BlockSpec((1, S, O_PAD), per_batch),
        scratch_shapes=[pltpu.VMEM((S, H), jnp.float32)],   # resident activation slab
        compiler_params=pltpu.CompilerParams(
            dimension_semantics=("parallel", "arbitrary")),
    )(
        we, pe, te, mask,
        params["emb_ln_g"], params["emb_ln_b"],
        params["wqkv"], params["bqkv"], params["wo"], params["bo"],
        params["ln1_g"], params["ln1_b"],
        params["w1"], params["b1"], params["w2"], params["b2"],
        params["ln2_g"], params["ln2_b"],
        params["pooler_w"], params["pooler_b"],
        params["cls_w"], params["cls_b"],
    )

    # CLS row, un-padded classifier columns
    return logits_pad[:, 0, :OUTPUT_SIZE]


# TODO(synk): pretrained bert-base-uncased weights are not loadable here; the encoder is
# a shape-faithful mini-BERT with deterministic synthetic parameters.

if __name__ == "__main__":
    B, S = 2, 8
    key = jax.random.PRNGKey(0)
    k_params, k_ids = jax.random.split(key)
    params = init_params(k_params)

    input_ids = jax.random.randint(k_ids, (B, S), 0, VOCAB, dtype=jnp.int32)
    attention_mask = jnp.array(
        [[1, 1, 1, 1, 1, 1, 1, 1],
         [1, 1, 1, 1, 1, 1, 0, 0]], dtype=jnp.int32
    )

    fwd = jax.jit(bert_classifier_forward)
    logits = fwd(params, input_ids, attention_mask)
    jax.block_until_ready(logits)
    assert logits.shape == (B, OUTPUT_SIZE)
    assert bool(jnp.all(jnp.isfinite(logits)))
    print("KERNEL_OK")
</pallas_src>

<mosaic_0001>
module attributes {stable_mosaic.version = 11 : i64} {
  func.func @_encoder_kernel(%arg0: i32, %arg1: i32, %arg2: memref<1x8x128xf32, #tpu.memory_space<vmem>>, %arg3: memref<8x128xf32, #tpu.memory_space<vmem>>, %arg4: memref<1x128xf32, #tpu.memory_space<vmem>>, %arg5: memref<1x1x8xf32, #tpu.memory_space<vmem>>, %arg6: memref<1x128xf32, #tpu.memory_space<vmem>>, %arg7: memref<1x128xf32, #tpu.memory_space<vmem>>, %arg8: memref<1x128x384xbf16, #tpu.memory_space<vmem>>, %arg9: memref<1x1x384xf32, #tpu.memory_space<vmem>>, %arg10: memref<1x128x128xbf16, #tpu.memory_space<vmem>>, %arg11: memref<1x1x128xf32, #tpu.memory_space<vmem>>, %arg12: memref<1x1x128xf32, #tpu.memory_space<vmem>>, %arg13: memref<1x1x128xf32, #tpu.memory_space<vmem>>, %arg14: memref<1x128x256xbf16, #tpu.memory_space<vmem>>, %arg15: memref<1x1x256xf32, #tpu.memory_space<vmem>>, %arg16: memref<1x256x128xbf16, #tpu.memory_space<vmem>>, %arg17: memref<1x1x128xf32, #tpu.memory_space<vmem>>, %arg18: memref<1x1x128xf32, #tpu.memory_space<vmem>>, %arg19: memref<1x1x128xf32, #tpu.memory_space<vmem>>, %arg20: memref<128x128xbf16, #tpu.memory_space<vmem>>, %arg21: memref<1x128xf32, #tpu.memory_space<vmem>>, %arg22: memref<128x128xbf16, #tpu.memory_space<vmem>>, %arg23: memref<1x128xf32, #tpu.memory_space<vmem>>, %arg24: memref<1x8x128xf32, #tpu.memory_space<vmem>>, %arg25: memref<8x128xf32, #tpu.memory_space<vmem>>) attributes {dimension_semantics = [#tpu.dimension_semantics<parallel>, #tpu.dimension_semantics<arbitrary>], iteration_bounds = array<i64: 2, 2>, scalar_prefetch = 0 : i64, scratch_operands = 1 : i64, tpu.core_type = #tpu.core_type<tc>, window_params = [{transform_indices = @transform_0, window_bounds = array<i64: 1, 8, 128>}, {pipeline_mode = #tpu.pipeline_mode<synchronous>, transform_indices = @transform_1, window_bounds = array<i64: 8, 128>}, {pipeline_mode = #tpu.pipeline_mode<synchronous>, transform_indices = @transform_2, window_bounds = array<i64: 1, 128>}, {transform_indices = @transform_3, window_bounds = array<i64: 1, 1, 8>}, {pipeline_mode = #tpu.pipeline_mode<synchronous>, transform_indices = @transform_4, window_bounds = array<i64: 1, 128>}, {pipeline_mode = #tpu.pipeline_mode<synchronous>, transform_indices = @transform_5, window_bounds = array<i64: 1, 128>}, {transform_indices = @transform_6, window_bounds = array<i64: 1, 128, 384>}, {transform_indices = @transform_7, window_bounds = array<i64: 1, 1, 384>}, {transform_indices = @transform_8, window_bounds = array<i64: 1, 128, 128>}, {transform_indices = @transform_9, window_bounds = array<i64: 1, 1, 128>}, {transform_indices = @transform_10, window_bounds = array<i64: 1, 1, 128>}, {transform_indices = @transform_11, window_bounds = array<i64: 1, 1, 128>}, {transform_indices = @transform_12, window_bounds = array<i64: 1, 128, 256>}, {transform_indices = @transform_13, window_bounds = array<i64: 1, 1, 256>}, {transform_indices = @transform_14, window_bounds = array<i64: 1, 256, 128>}, {transform_indices = @transform_15, window_bounds = array<i64: 1, 1, 128>}, {transform_indices = @transform_16, window_bounds = array<i64: 1, 1, 128>}, {transform_indices = @transform_17, window_bounds = array<i64: 1, 1, 128>}, {pipeline_mode = #tpu.pipeline_mode<synchronous>, transform_indices = @transform_18, window_bounds = array<i64: 128, 128>}, {pipeline_mode = #tpu.pipeline_mode<synchronous>, transform_indices = @transform_19, window_bounds = array<i64: 1, 128>}, {pipeline_mode = #tpu.pipeline_mode<synchronous>, transform_indices = @transform_20, window_bounds = array<i64: 128, 128>}, {pipeline_mode = #tpu.pipeline_mode<synchronous>, transform_indices = @transform_21, window_bounds = array<i64: 1, 128>}, {transform_indices = @transform_22, window_bounds = array<i64: 1, 8, 128>}]} {
    %c0_i32 = arith.constant 0 : i32
    %0 = arith.cmpi eq, %arg1, %c0_i32 : i32
    %1 = arith.extui %0 : i1 to i32
    %c0_i32_0 = arith.constant 0 : i32
    %2 = arith.cmpi ne, %1, %c0_i32_0 : i32
    scf.if %2 {
      %c0_85 = arith.constant 0 : index
      %c0_86 = arith.constant 0 : index
      %c0_87 = arith.constant 0 : index
      %210 = vector.load %arg2[%c0_85, %c0_86, %c0_87] : memref<1x8x128xf32, #tpu.memory_space<vmem>>, vector<1x8x128xf32>
      %211 = vector.shape_cast %210 : vector<1x8x128xf32> to vector<8x128xf32>
      %c0_88 = arith.constant 0 : index
      %c0_89 = arith.constant 0 : index
      %212 = vector.load %arg3[%c0_88, %c0_89] : memref<8x128xf32, #tpu.memory_space<vmem>>, vector<8x128xf32>
      %213 = arith.addf %211, %212 : vector<8x128xf32>
      %c0_90 = arith.constant 0 : index
      %c0_91 = arith.constant 0 : index
      %214 = vector.load %arg4[%c0_90, %c0_91] : memref<1x128xf32, #tpu.memory_space<vmem>>, vector<1x128xf32>
      %215 = vector.broadcast %214 : vector<1x128xf32> to vector<8x128xf32>
      %216 = arith.addf %213, %215 : vector<8x128xf32>
      %c0_92 = arith.constant 0 : index
      %c0_93 = arith.constant 0 : index
      %217 = vector.load %arg6[%c0_92, %c0_93] : memref<1x128xf32, #tpu.memory_space<vmem>>, vector<1x128xf32>
      %c0_94 = arith.constant 0 : index
      %c0_95 = arith.constant 0 : index
      %218 = vector.load %arg7[%c0_94, %c0_95] : memref<1x128xf32, #tpu.memory_space<vmem>>, vector<1x128xf32>
      %cst_96 = arith.constant dense<0.000000e+00> : vector<8xf32>
      %219 = vector.multi_reduction <add>, %216, %cst_96 [1] : vector<8x128xf32> to vector<8xf32>
      %220 = vector.shape_cast %219 : vector<8xf32> to vector<8x1xf32>
      %cst_97 = arith.constant 1.280000e+02 : f32
      %221 = vector.broadcast %cst_97 : f32 to vector<8x1xf32>
      %222 = arith.divf %220, %221 : vector<8x1xf32>
      %223 = arith.mulf %216, %216 : vector<8x128xf32>
      %cst_98 = arith.constant dense<0.000000e+00> : vector<8xf32>
      %224 = vector.multi_reduction <add>, %223, %cst_98 [1] : vector<8x128xf32> to vector<8xf32>
      %225 = vector.shape_cast %224 : vector<8xf32> to vector<8x1xf32>
      %cst_99 = arith.constant 1.280000e+02 : f32
      %226 = vector.broadcast %cst_99 : f32 to vector<8x1xf32>
      %227 = arith.divf %225, %226 : vector<8x1xf32>
      %228 = arith.mulf %222, %222 : vector<8x1xf32>
      %229 = arith.subf %227, %228 : vector<8x1xf32>
      %cst_100 = arith.constant 0.000000e+00 : f32
      %230 = vector.broadcast %cst_100 : f32 to vector<8x1xf32>
      %231 = arith.maximumf %229, %230 : vector<8x1xf32>
      %232 = vector.broadcast %222 : vector<8x1xf32> to vector<8x128xf32>
      %233 = arith.subf %216, %232 : vector<8x128xf32>
      %cst_101 = arith.constant 9.99999996E-13 : f32
      %234 = vector.broadcast %cst_101 : f32 to vector<8x1xf32>
      %235 = arith.addf %231, %234 : vector<8x1xf32>
      %236 = math.rsqrt %235 : vector<8x1xf32>
      %237 = vector.broadcast %236 : vector<8x1xf32> to vector<8x128xf32>
      %238 = arith.mulf %233, %237 : vector<8x128xf32>
      %239 = vector.broadcast %217 : vector<1x128xf32> to vector<8x128xf32>
      %240 = arith.mulf %238, %239 : vector<8x128xf32>
      %241 = vector.broadcast %218 : vector<1x128xf32> to vector<8x128xf32>
      %242 = arith.addf %240, %241 : vector<8x128xf32>
      %c0_102 = arith.constant 0 : index
      %c0_103 = arith.constant 0 : index
      %243 = vector.load %arg25[%c0_102, %c0_103] : memref<8x128xf32, #tpu.memory_space<vmem>>, vector<8x128xf32>
      tpu.vector_store %arg25[%c0_102, %c0_103], %242 {strides = array<i32>} : memref<8x128xf32, #tpu.memory_space<vmem>>, vector<8x128xf32>,
    } else {
    }
    %c0 = arith.constant 0 : index
    %c0_1 = arith.constant 0 : index
    %3 = vector.load %arg25[%c0, %c0_1] : memref<8x128xf32, #tpu.memory_space<vmem>>, vector<8x128xf32>
    %4 = arith.truncf %3 : vector<8x128xf32> to vector<8x128xbf16>
    %c0_2 = arith.constant 0 : index
    %c0_3 = arith.constant 0 : index
    %c0_4 = arith.constant 0 : index
    %5 = vector.load %arg8[%c0_2, %c0_3, %c0_4] : memref<1x128x384xbf16, #tpu.memory_space<vmem>>, vector<1x128x384xbf16>
    %6 = vector.shape_cast %5 : vector<1x128x384xbf16> to vector<128x384xbf16>
    %cst = arith.constant dense<0.000000e+00> : vector<8x384xf32>
    %7 = tpu.matmul %4, %6, %cst {dimension_numbers = #tpu.dot_dimension_numbers<[1], [0], [0], [1], [0, 0, 1, 1], [], []>} : vector<8x128xbf16>, vector<128x384xbf16>, vector<8x384xf32> -> vector<8x384xf32>
    %c0_5 = arith.constant 0 : index
    %c0_6 = arith.constant 0 : index
    %c0_7 = arith.constant 0 : index
    %8 = vector.load %arg9[%c0_5, %c0_6, %c0_7] : memref<1x1x384xf32, #tpu.memory_space<vmem>>, vector<1x1x384xf32>
    %9 = vector.shape_cast %8 : vector<1x1x384xf32> to vector<1x384xf32>
    %10 = vector.broadcast %9 : vector<1x384xf32> to vector<8x384xf32>
    %11 = arith.addf %7, %10 : vector<8x384xf32>
    %c0_8 = arith.constant 0 : index
    %c0_9 = arith.constant 0 : index
    %c0_10 = arith.constant 0 : index
    %12 = vector.load %arg5[%c0_8, %c0_9, %c0_10] : memref<1x1x8xf32, #tpu.memory_space<vmem>>, vector<1x1x8xf32>
    %13 = vector.shape_cast %12 : vector<1x1x8xf32> to vector<1x8xf32>
    %cst_11 = arith.constant 1.000000e+00 : f32
    %14 = vector.broadcast %cst_11 : f32 to vector<1x8xf32>
    %15 = arith.subf %13, %14 : vector<1x8xf32>
    %cst_12 = arith.constant 1.000000e+09 : f32
    %16 = vector.broadcast %cst_12 : f32 to vector<1x8xf32>
    %17 = arith.mulf %15, %16 : vector<1x8xf32>
    %18 = vector.extract_strided_slice %11 {offsets = [0, 0], sizes = [8, 32], strides = [1, 1]} : vector<8x384xf32> to vector<8x32xf32>
    %19 = arith.truncf %18 : vector<8x32xf32> to vector<8x32xbf16>
    %20 = vector.extract_strided_slice %11 {offsets = [0, 128], sizes = [8, 32], strides = [1, 1]} : vector<8x384xf32> to vector<8x32xf32>
    %21 = arith.truncf %20 : vector<8x32xf32> to vector<8x32xbf16>
    %22 = vector.extract_strided_slice %11 {offsets = [0, 256], sizes = [8, 32], strides = [1, 1]} : vector<8x384xf32> to vector<8x32xf32>
    %23 = arith.truncf %22 : vector<8x32xf32> to vector<8x32xbf16>
    %cst_13 = arith.constant dense<0.000000e+00> : vector<8x8xf32>
    %24 = tpu.matmul %19, %21, %cst_13 {dimension_numbers = #tpu.dot_dimension_numbers<[1], [1], [0], [0], [0, 0, 1, 0], [], []>} : vector<8x32xbf16>, vector<8x32xbf16>, vector<8x8xf32> -> vector<8x8xf32>
    %cst_14 = arith.constant 0.176776692 : f32
    %25 = vector.broadcast %cst_14 : f32 to vector<8x8xf32>
    %26 = arith.mulf %24, %25 : vector<8x8xf32>
    %27 = vector.broadcast %17 : vector<1x8xf32> to vector<8x8xf32>
    %28 = arith.addf %26, %27 : vector<8x8xf32>
    %cst_15 = arith.constant dense<0xFF800000> : vector<8xf32>
    %29 = vector.multi_reduction <maximumf>, %28, %cst_15 [1] : vector<8x8xf32> to vector<8xf32>
    %30 = vector.shape_cast %29 : vector<8xf32> to vector<8x1xf32>
    %31 = vector.broadcast %30 : vector<8x1xf32> to vector<8x8xf32>
    %32 = arith.subf %28, %31 : vector<8x8xf32>
    %33 = math.exp %32 : vector<8x8xf32>
    %cst_16 = arith.constant dense<0.000000e+00> : vector<8xf32>
    %34 = vector.multi_reduction <add>, %33, %cst_16 [1] : vector<8x8xf32> to vector<8xf32>
    %35 = vector.shape_cast %34 : vector<8xf32> to vector<8x1xf32>
    %36 = tpu.reciprocal %35 {approx = true} : vector<8x1xf32> -> vector<8x1xf32>
    %37 = vector.broadcast %36 : vector<8x1xf32> to vector<8x8xf32>
    %38 = arith.mulf %33, %37 : vector<8x8xf32>
    %39 = arith.truncf %38 : vector<8x8xf32> to vector<8x8xbf16>
    %cst_17 = arith.constant dense<0.000000e+00> : vector<8x32xf32>
    %40 = tpu.matmul %39, %23, %cst_17 {dimension_numbers = #tpu.dot_dimension_numbers<[1], [0], [0], [1], [0, 0, 1, 1], [], []>} : vector<8x8xbf16>, vector<8x32xbf16>, vector<8x32xf32> -> vector<8x32xf32>
    %41 = vector.extract_strided_slice %11 {offsets = [0, 32], sizes = [8, 32], strides = [1, 1]} : vector<8x384xf32> to vector<8x32xf32>
    %42 = arith.truncf %41 : vector<8x32xf32> to vector<8x32xbf16>
    %43 = vector.extract_strided_slice %11 {offsets = [0, 160], sizes = [8, 32], strides = [1, 1]} : vector<8x384xf32> to vector<8x32xf32>
    %44 = arith.truncf %43 : vector<8x32xf32> to vector<8x32xbf16>
    %45 = vector.extract_strided_slice %11 {offsets = [0, 288], sizes = [8, 32], strides = [1, 1]} : vector<8x384xf32> to vector<8x32xf32>
    %46 = arith.truncf %45 : vector<8x32xf32> to vector<8x32xbf16>
    %cst_18 = arith.constant dense<0.000000e+00> : vector<8x8xf32>
    %47 = tpu.matmul %42, %44, %cst_18 {dimension_numbers = #tpu.dot_dimension_numbers<[1], [1], [0], [0], [0, 0, 1, 0], [], []>} : vector<8x32xbf16>, vector<8x32xbf16>, vector<8x8xf32> -> vector<8x8xf32>
    %cst_19 = arith.constant 0.176776692 : f32
    %48 = vector.broadcast %cst_19 : f32 to vector<8x8xf32>
    %49 = arith.mulf %47, %48 : vector<8x8xf32>
    %50 = vector.broadcast %17 : vector<1x8xf32> to vector<8x8xf32>
    %51 = arith.addf %49, %50 : vector<8x8xf32>
    %cst_20 = arith.constant dense<0xFF800000> : vector<8xf32>
    %52 = vector.multi_reduction <maximumf>, %51, %cst_20 [1] : vector<8x8xf32> to vector<8xf32>
    %53 = vector.shape_cast %52 : vector<8xf32> to vector<8x1xf32>
    %54 = vector.broadcast %53 : vector<8x1xf32> to vector<8x8xf32>
    %55 = arith.subf %51, %54 : vector<8x8xf32>
    %56 = math.exp %55 : vector<8x8xf32>
    %cst_21 = arith.constant dense<0.000000e+00> : vector<8xf32>
    %57 = vector.multi_reduction <add>, %56, %cst_21 [1] : vector<8x8xf32> to vector<8xf32>
    %58 = vector.shape_cast %57 : vector<8xf32> to vector<8x1xf32>
    %59 = tpu.reciprocal %58 {approx = true} : vector<8x1xf32> -> vector<8x1xf32>
    %60 = vector.broadcast %59 : vector<8x1xf32> to vector<8x8xf32>
    %61 = arith.mulf %56, %60 : vector<8x8xf32>
    %62 = arith.truncf %61 : vector<8x8xf32> to vector<8x8xbf16>
    %cst_22 = arith.constant dense<0.000000e+00> : vector<8x32xf32>
    %63 = tpu.matmul %62, %46, %cst_22 {dimension_numbers = #tpu.dot_dimension_numbers<[1], [0], [0], [1], [0, 0, 1, 1], [], []>} : vector<8x8xbf16>, vector<8x32xbf16>, vector<8x32xf32> -> vector<8x32xf32>
    %64 = vector.extract_strided_slice %11 {offsets = [0, 64], sizes = [8, 32], strides = [1, 1]} : vector<8x384xf32> to vector<8x32xf32>
    %65 = arith.truncf %64 : vector<8x32xf32> to vector<8x32xbf16>
    %66 = vector.extract_strided_slice %11 {offsets = [0, 192], sizes = [8, 32], strides = [1, 1]} : vector<8x384xf32> to vector<8x32xf32>
    %67 = arith.truncf %66 : vector<8x32xf32> to vector<8x32xbf16>
    %68 = vector.extract_strided_slice %11 {offsets = [0, 320], sizes = [8, 32], strides = [1, 1]} : vector<8x384xf32> to vector<8x32xf32>
    %69 = arith.truncf %68 : vector<8x32xf32> to vector<8x32xbf16>
    %cst_23 = arith.constant dense<0.000000e+00> : vector<8x8xf32>
    %70 = tpu.matmul %65, %67, %cst_23 {dimension_numbers = #tpu.dot_dimension_numbers<[1], [1], [0], [0], [0, 0, 1, 0], [], []>} : vector<8x32xbf16>, vector<8x32xbf16>, vector<8x8xf32> -> vector<8x8xf32>
    %cst_24 = arith.constant 0.176776692 : f32
    %71 = vector.broadcast %cst_24 : f32 to vector<8x8xf32>
    %72 = arith.mulf %70, %71 : vector<8x8xf32>
    %73 = vector.broadcast %17 : vector<1x8xf32> to vector<8x8xf32>
    %74 = arith.addf %72, %73 : vector<8x8xf32>
    %cst_25 = arith.constant dense<0xFF800000> : vector<8xf32>
    %75 = vector.multi_reduction <maximumf>, %74, %cst_25 [1] : vector<8x8xf32> to vector<8xf32>
    %76 = vector.shape_cast %75 : vector<8xf32> to vector<8x1xf32>
    %77 = vector.broadcast %76 : vector<8x1xf32> to vector<8x8xf32>
    %78 = arith.subf %74, %77 : vector<8x8xf32>
    %79 = math.exp %78 : vector<8x8xf32>
    %cst_26 = arith.constant dense<0.000000e+00> : vector<8xf32>
    %80 = vector.multi_reduction <add>, %79, %cst_26 [1] : vector<8x8xf32> to vector<8xf32>
    %81 = vector.shape_cast %80 : vector<8xf32> to vector<8x1xf32>
    %82 = tpu.reciprocal %81 {approx = true} : vector<8x1xf32> -> vector<8x1xf32>
    %83 = vector.broadcast %82 : vector<8x1xf32> to vector<8x8xf32>
    %84 = arith.mulf %79, %83 : vector<8x8xf32>
    %85 = arith.truncf %84 : vector<8x8xf32> to vector<8x8xbf16>
    %cst_27 = arith.constant dense<0.000000e+00> : vector<8x32xf32>
    %86 = tpu.matmul %85, %69, %cst_27 {dimension_numbers = #tpu.dot_dimension_numbers<[1], [0], [0], [1], [0, 0, 1, 1], [], []>} : vector<8x8xbf16>, vector<8x32xbf16>, vector<8x32xf32> -> vector<8x32xf32>
    %87 = vector.extract_strided_slice %11 {offsets = [0, 96], sizes = [8, 32], strides = [1, 1]} : vector<8x384xf32> to vector<8x32xf32>
    %88 = arith.truncf %87 : vector<8x32xf32> to vector<8x32xbf16>
    %89 = vector.extract_strided_slice %11 {offsets = [0, 224], sizes = [8, 32], strides = [1, 1]} : vector<8x384xf32> to vector<8x32xf32>
    %90 = arith.truncf %89 : vector<8x32xf32> to vector<8x32xbf16>
    %91 = vector.extract_strided_slice %11 {offsets = [0, 352], sizes = [8, 32], strides = [1, 1]} : vector<8x384xf32> to vector<8x32xf32>
    %92 = arith.truncf %91 : vector<8x32xf32> to vector<8x32xbf16>
    %cst_28 = arith.constant dense<0.000000e+00> : vector<8x8xf32>
    %93 = tpu.matmul %88, %90, %cst_28 {dimension_numbers = #tpu.dot_dimension_numbers<[1], [1], [0], [0], [0, 0, 1, 0], [], []>} : vector<8x32xbf16>, vector<8x32xbf16>, vector<8x8xf32> -> vector<8x8xf32>
    %cst_29 = arith.constant 0.176776692 : f32
    %94 = vector.broadcast %cst_29 : f32 to vector<8x8xf32>
    %95 = arith.mulf %93, %94 : vector<8x8xf32>
    %96 = vector.broadcast %17 : vector<1x8xf32> to vector<8x8xf32>
    %97 = arith.addf %95, %96 : vector<8x8xf32>
    %cst_30 = arith.constant dense<0xFF800000> : vector<8xf32>
    %98 = vector.multi_reduction <maximumf>, %97, %cst_30 [1] : vector<8x8xf32> to vector<8xf32>
    %99 = vector.shape_cast %98 : vector<8xf32> to vector<8x1xf32>
    %100 = vector.broadcast %99 : vector<8x1xf32> to vector<8x8xf32>
    %101 = arith.subf %97, %100 : vector<8x8xf32>
    %102 = math.exp %101 : vector<8x8xf32>
    %cst_31 = arith.constant dense<0.000000e+00> : vector<8xf32>
    %103 = vector.multi_reduction <add>, %102, %cst_31 [1] : vector<8x8xf32> to vector<8xf32>
    %104 = vector.shape_cast %103 : vector<8xf32> to vector<8x1xf32>
    %105 = tpu.reciprocal %104 {approx = true} : vector<8x1xf32> -> vector<8x1xf32>
    %106 = vector.broadcast %105 : vector<8x1xf32> to vector<8x8xf32>
    %107 = arith.mulf %102, %106 : vector<8x8xf32>
    %108 = arith.truncf %107 : vector<8x8xf32> to vector<8x8xbf16>
    %cst_32 = arith.constant dense<0.000000e+00> : vector<8x32xf32>
    %109 = tpu.matmul %108, %92, %cst_32 {dimension_numbers = #tpu.dot_dimension_numbers<[1], [0], [0], [1], [0, 0, 1, 1], [], []>} : vector<8x8xbf16>, vector<8x32xbf16>, vector<8x32xf32> -> vector<8x32xf32>
    %110 = tpu.concatenate %40, %63, %86, %109 in 1 : vector<8x32xf32>, vector<8x32xf32>, vector<8x32xf32>, vector<8x32xf32> -> vector<8x128xf32>
    %111 = arith.truncf %110 : vector<8x128xf32> to vector<8x128xbf16>
    %c0_33 = arith.constant 0 : index
    %c0_34 = arith.constant 0 : index
    %c0_35 = arith.constant 0 : index
    %112 = vector.load %arg10[%c0_33, %c0_34, %c0_35] : memref<1x128x128xbf16, #tpu.memory_space<vmem>>, vector<1x128x128xbf16>
    %113 = vector.shape_cast %112 : vector<1x128x128xbf16> to vector<128x128xbf16>
    %cst_36 = arith.constant dense<0.000000e+00> : vector<8x128xf32>
    %114 = tpu.matmul %111, %113, %cst_36 {dimension_numbers = #tpu.dot_dimension_numbers<[1], [0], [0], [1], [0, 0, 1, 1], [], []>} : vector<8x128xbf16>, vector<128x128xbf16>, vector<8x128xf32> -> vector<8x128xf32>
    %c0_37 = arith.constant 0 : index
    %c0_38 = arith.constant 0 : index
    %c0_39 = arith.constant 0 : index
    %115 = vector.load %arg11[%c0_37, %c0_38, %c0_39] : memref<1x1x128xf32, #tpu.memory_space<vmem>>, vector<1x1x128xf32>
    %116 = vector.shape_cast %115 : vector<1x1x128xf32> to vector<1x128xf32>
    %117 = vector.broadcast %116 : vector<1x128xf32> to vector<8x128xf32>
    %118 = arith.addf %114, %117 : vector<8x128xf32>
    %119 = arith.addf %118, %3 : vector<8x128xf32>
    %c0_40 = arith.constant 0 : index
    %c0_41 = arith.constant 0 : index
    %c0_42 = arith.constant 0 : index
    %120 = vector.load %arg12[%c0_40, %c0_41, %c0_42] : memref<1x1x128xf32, #tpu.memory_space<vmem>>, vector<1x1x128xf32>
    %121 = vector.shape_cast %120 : vector<1x1x128xf32> to vector<1x128xf32>
    %c0_43 = arith.constant 0 : index
    %c0_44 = arith.constant 0 : index
    %c0_45 = arith.constant 0 : index
    %122 = vector.load %arg13[%c0_43, %c0_44, %c0_45] : memref<1x1x128xf32, #tpu.memory_space<vmem>>, vector<1x1x128xf32>
    %123 = vector.shape_cast %122 : vector<1x1x128xf32> to vector<1x128xf32>
    %cst_46 = arith.constant dense<0.000000e+00> : vector<8xf32>
    %124 = vector.multi_reduction <add>, %119, %cst_46 [1] : vector<8x128xf32> to vector<8xf32>
    %125 = vector.shape_cast %124 : vector<8xf32> to vector<8x1xf32>
    %cst_47 = arith.constant 1.280000e+02 : f32
    %126 = vector.broadcast %cst_47 : f32 to vector<8x1xf32>
    %127 = arith.divf %125, %126 : vector<8x1xf32>
    %128 = arith.mulf %119, %119 : vector<8x128xf32>
    %cst_48 = arith.constant dense<0.000000e+00> : vector<8xf32>
    %129 = vector.multi_reduction <add>, %128, %cst_48 [1] : vector<8x128xf32> to vector<8xf32>
    %130 = vector.shape_cast %129 : vector<8xf32> to vector<8x1xf32>
    %cst_49 = arith.constant 1.280000e+02 : f32
    %131 = vector.broadcast %cst_49 : f32 to vector<8x1xf32>
    %132 = arith.divf %130, %131 : vector<8x1xf32>
    %133 = arith.mulf %127, %127 : vector<8x1xf32>
    %134 = arith.subf %132, %133 : vector<8x1xf32>
    %cst_50 = arith.constant 0.000000e+00 : f32
    %135 = vector.broadcast %cst_50 : f32 to vector<8x1xf32>
    %136 = arith.maximumf %134, %135 : vector<8x1xf32>
    %137 = vector.broadcast %127 : vector<8x1xf32> to vector<8x128xf32>
    %138 = arith.subf %119, %137 : vector<8x128xf32>
    %cst_51 = arith.constant 9.99999996E-13 : f32
    %139 = vector.broadcast %cst_51 : f32 to vector<8x1xf32>
    %140 = arith.addf %136, %139 : vector<8x1xf32>
    %141 = math.rsqrt %140 : vector<8x1xf32>
    %142 = vector.broadcast %141 : vector<8x1xf32> to vector<8x128xf32>
    %143 = arith.mulf %138, %142 : vector<8x128xf32>
    %144 = vector.broadcast %121 : vector<1x128xf32> to vector<8x128xf32>
    %145 = arith.mulf %143, %144 : vector<8x128xf32>
    %146 = vector.broadcast %123 : vector<1x128xf32> to vector<8x128xf32>
    %147 = arith.addf %145, %146 : vector<8x128xf32>
    %148 = arith.truncf %147 : vector<8x128xf32> to vector<8x128xbf16>
    %c0_52 = arith.constant 0 : index
    %c0_53 = arith.constant 0 : index
    %c0_54 = arith.constant 0 : index
    %149 = vector.load %arg14[%c0_52, %c0_53, %c0_54] : memref<1x128x256xbf16, #tpu.memory_space<vmem>>, vector<1x128x256xbf16>
    %150 = vector.shape_cast %149 : vector<1x128x256xbf16> to vector<128x256xbf16>
    %cst_55 = arith.constant dense<0.000000e+00> : vector<8x256xf32>
    %151 = tpu.matmul %148, %150, %cst_55 {dimension_numbers = #tpu.dot_dimension_numbers<[1], [0], [0], [1], [0, 0, 1, 1], [], []>} : vector<8x128xbf16>, vector<128x256xbf16>, vector<8x256xf32> -> vector<8x256xf32>
    %c0_56 = arith.constant 0 : index
    %c0_57 = arith.constant 0 : index
    %c0_58 = arith.constant 0 : index
    %152 = vector.load %arg15[%c0_56, %c0_57, %c0_58] : memref<1x1x256xf32, #tpu.memory_space<vmem>>, vector<1x1x256xf32>
    %153 = vector.shape_cast %152 : vector<1x1x256xf32> to vector<1x256xf32>
    %154 = vector.broadcast %153 : vector<1x256xf32> to vector<8x256xf32>
    %155 = arith.addf %151, %154 : vector<8x256xf32>
    %156 = arith.mulf %155, %155 : vector<8x256xf32>
    %157 = arith.mulf %155, %156 : vector<8x256xf32>
    %cst_59 = arith.constant 4.471500e-02 : f32
    %158 = vector.broadcast %cst_59 : f32 to vector<8x256xf32>
    %159 = arith.mulf %158, %157 : vector<8x256xf32>
    %160 = arith.addf %155, %159 : vector<8x256xf32>
    %cst_60 = arith.constant 0.797884583 : f32
    %161 = vector.broadcast %cst_60 : f32 to vector<8x256xf32>
    %162 = arith.mulf %161, %160 : vector<8x256xf32>
    %163 = math.tanh %162 : vector<8x256xf32>
    %cst_61 = arith.constant 1.000000e+00 : f32
    %164 = vector.broadcast %cst_61 : f32 to vector<8x256xf32>
    %165 = arith.addf %164, %163 : vector<8x256xf32>
    %cst_62 = arith.constant 5.000000e-01 : f32
    %166 = vector.broadcast %cst_62 : f32 to vector<8x256xf32>
    %167 = arith.mulf %166, %165 : vector<8x256xf32>
    %168 = arith.mulf %155, %167 : vector<8x256xf32>
    %169 = arith.truncf %168 : vector<8x256xf32> to vector<8x256xbf16>
    %c0_63 = arith.constant 0 : index
    %c0_64 = arith.constant 0 : index
    %c0_65 = arith.constant 0 : index
    %170 = vector.load %arg16[%c0_63, %c0_64, %c0_65] : memref<1x256x128xbf16, #tpu.memory_space<vmem>>, vector<1x256x128xbf16>
    %171 = vector.shape_cast %170 : vector<1x256x128xbf16> to vector<256x128xbf16>
    %cst_66 = arith.constant dense<0.000000e+00> : vector<8x128xf32>
    %172 = tpu.matmul %169, %171, %cst_66 {dimension_numbers = #tpu.dot_dimension_numbers<[1], [0], [0], [1], [0, 0, 1, 1], [], []>} : vector<8x256xbf16>, vector<256x128xbf16>, vector<8x128xf32> -> vector<8x128xf32>
    %c0_67 = arith.constant 0 : index
    %c0_68 = arith.constant 0 : index
    %c0_69 = arith.constant 0 : index
    %173 = vector.load %arg17[%c0_67, %c0_68, %c0_69] : memref<1x1x128xf32, #tpu.memory_space<vmem>>, vector<1x1x128xf32>
    %174 = vector.shape_cast %173 : vector<1x1x128xf32> to vector<1x128xf32>
    %175 = vector.broadcast %174 : vector<1x128xf32> to vector<8x128xf32>
    %176 = arith.addf %172, %175 : vector<8x128xf32>
    %177 = arith.addf %176, %147 : vector<8x128xf32>
    %c0_70 = arith.constant 0 : index
    %c0_71 = arith.constant 0 : index
    %c0_72 = arith.constant 0 : index
    %178 = vector.load %arg18[%c0_70, %c0_71, %c0_72] : memref<1x1x128xf32, #tpu.memory_space<vmem>>, vector<1x1x128xf32>
    %179 = vector.shape_cast %178 : vector<1x1x128xf32> to vector<1x128xf32>
    %c0_73 = arith.constant 0 : index
    %c0_74 = arith.constant 0 : index
    %c0_75 = arith.constant 0 : index
    %180 = vector.load %arg19[%c0_73, %c0_74, %c0_75] : memref<1x1x128xf32, #tpu.memory_space<vmem>>, vector<1x1x128xf32>
    %181 = vector.shape_cast %180 : vector<1x1x128xf32> to vector<1x128xf32>
    %cst_76 = arith.constant dense<0.000000e+00> : vector<8xf32>
    %182 = vector.multi_reduction <add>, %177, %cst_76 [1] : vector<8x128xf32> to vector<8xf32>
    %183 = vector.shape_cast %182 : vector<8xf32> to vector<8x1xf32>
    %cst_77 = arith.constant 1.280000e+02 : f32
    %184 = vector.broadcast %cst_77 : f32 to vector<8x1xf32>
    %185 = arith.divf %183, %184 : vector<8x1xf32>
    %186 = arith.mulf %177, %177 : vector<8x128xf32>
    %cst_78 = arith.constant dense<0.000000e+00> : vector<8xf32>
    %187 = vector.multi_reduction <add>, %186, %cst_78 [1] : vector<8x128xf32> to vector<8xf32>
    %188 = vector.shape_cast %187 : vector<8xf32> to vector<8x1xf32>
    %cst_79 = arith.constant 1.280000e+02 : f32
    %189 = vector.broadcast %cst_79 : f32 to vector<8x1xf32>
    %190 = arith.divf %188, %189 : vector<8x1xf32>
    %191 = arith.mulf %185, %185 : vector<8x1xf32>
    %192 = arith.subf %190, %191 : vector<8x1xf32>
    %cst_80 = arith.constant 0.000000e+00 : f32
    %193 = vector.broadcast %cst_80 : f32 to vector<8x1xf32>
    %194 = arith.maximumf %192, %193 : vector<8x1xf32>
    %195 = vector.broadcast %185 : vector<8x1xf32> to vector<8x128xf32>
    %196 = arith.subf %177, %195 : vector<8x128xf32>
    %cst_81 = arith.constant 9.99999996E-13 : f32
    %197 = vector.broadcast %cst_81 : f32 to vector<8x1xf32>
    %198 = arith.addf %194, %197 : vector<8x1xf32>
    %199 = math.rsqrt %198 : vector<8x1xf32>
    %200 = vector.broadcast %199 : vector<8x1xf32> to vector<8x128xf32>
    %201 = arith.mulf %196, %200 : vector<8x128xf32>
    %202 = vector.broadcast %179 : vector<1x128xf32> to vector<8x128xf32>
    %203 = arith.mulf %201, %202 : vector<8x128xf32>
    %204 = vector.broadcast %181 : vector<1x128xf32> to vector<8x128xf32>
    %205 = arith.addf %203, %204 : vector<8x128xf32>
    %c0_82 = arith.constant 0 : index
    %c0_83 = arith.constant 0 : index
    %206 = vector.load %arg25[%c0_82, %c0_83] : memref<8x128xf32, #tpu.memory_space<vmem>>, vector<8x128xf32>
    tpu.vector_store %arg25[%c0_82, %c0_83], %205 {strides = array<i32>} : memref<8x128xf32, #tpu.memory_space<vmem>>, vector<8x128xf32>,
    %c1_i32 = arith.constant 1 : i32
    %207 = arith.cmpi eq, %arg1, %c1_i32 : i32
    %208 = arith.extui %207 : i1 to i32
    %c0_i32_84 = arith.constant 0 : i32
    %209 = arith.cmpi ne, %208, %c0_i32_84 : i32
    scf.if %209 {
      %210 = arith.truncf %205 : vector<8x128xf32> to vector<8x128xbf16>
      %c0_85 = arith.constant 0 : index
      %c0_86 = arith.constant 0 : index
      %211 = vector.load %arg20[%c0_85, %c0_86] : memref<128x128xbf16, #tpu.memory_space<vmem>>, vector<128x128xbf16>
      %cst_87 = arith.constant dense<0.000000e+00> : vector<8x128xf32>
      %212 = tpu.matmul %210, %211, %cst_87 {dimension_numbers = #tpu.dot_dimension_numbers<[1], [0], [0], [1], [0, 0, 1, 1], [], []>} : vector<8x128xbf16>, vector<128x128xbf16>, vector<8x128xf32> -> vector<8x128xf32>
      %c0_88 = arith.constant 0 : index
      %c0_89 = arith.constant 0 : index
      %213 = vector.load %arg21[%c0_88, %c0_89] : memref<1x128xf32, #tpu.memory_space<vmem>>, vector<1x128xf32>
      %214 = vector.broadcast %213 : vector<1x128xf32> to vector<8x128xf32>
      %215 = arith.addf %212, %214 : vector<8x128xf32>
      %216 = math.tanh %215 : vector<8x128xf32>
      %217 = arith.truncf %216 : vector<8x128xf32> to vector<8x128xbf16>
      %c0_90 = arith.constant 0 : index
      %c0_91 = arith.constant 0 : index
      %218 = vector.load %arg22[%c0_90, %c0_91] : memref<128x128xbf16, #tpu.memory_space<vmem>>, vector<128x128xbf16>
      %cst_92 = arith.constant dense<0.000000e+00> : vector<8x128xf32>
      %219 = tpu.matmul %217, %218, %cst_92 {dimension_numbers = #tpu.dot_dimension_numbers<[1], [0], [0], [1], [0, 0, 1, 1], [], []>} : vector<8x128xbf16>, vector<128x128xbf16>, vector<8x128xf32> -> vector<8x128xf32>
      %c0_93 = arith.constant 0 : index
      %c0_94 = arith.constant 0 : index
      %220 = vector.load %arg23[%c0_93, %c0_94] : memref<1x128xf32, #tpu.memory_space<vmem>>, vector<1x128xf32>
      %221 = vector.broadcast %220 : vector<1x128xf32> to vector<8x128xf32>
      %222 = arith.addf %219, %221 : vector<8x128xf32>
      %c0_95 = arith.constant 0 : index
      %c0_96 = arith.constant 0 : index
      %c0_97 = arith.constant 0 : index
      %223 = vector.load %arg24[%c0_95, %c0_96, %c0_97] : memref<1x8x128xf32, #tpu.memory_space<vmem>>, vector<1x8x128xf32>
      %224 = vector.shape_cast %223 : vector<1x8x128xf32> to vector<8x128xf32>
      %225 = vector.shape_cast %222 : vector<8x128xf32> to vector<1x8x128xf32>
      tpu.vector_store %arg24[%c0_95, %c0_96, %c0_97], %225 {strides = array<i32>} : memref<1x8x128xf32, #tpu.memory_space<vmem>>, vector<1x8x128xf32>,
    } else {
    }
    return
  }
  func.func @transform_0(%arg0: i32, %arg1: i32) -> (i32, i32, i32) {
    %c0_i32 = arith.constant 0 : i32
    %c0_i32_0 = arith.constant 0 : i32
    %c0_i32_1 = arith.constant 0 : i32
    return %arg0, %c0_i32, %c0_i32_0 : i32, i32, i32
  }
  func.func @transform_1(%arg0: i32, %arg1: i32) -> (i32, i32) {
    %c0_i32 = arith.constant 0 : i32
    %c0_i32_0 = arith.constant 0 : i32
    %c0_i32_1 = arith.constant 0 : i32
    return %c0_i32, %c0_i32_0 : i32, i32
  }
  func.func @transform_2(%arg0: i32, %arg1: i32) -> (i32, i32) {
    %c0_i32 = arith.constant 0 : i32
    %c0_i32_0 = arith.constant 0 : i32
    %c0_i32_1 = arith.constant 0 : i32
    return %c0_i32, %c0_i32_0 : i32, i32
  }
  func.func @transform_3(%arg0: i32, %arg1: i32) -> (i32, i32, i32) {
    %c0_i32 = arith.constant 0 : i32
    %c0_i32_0 = arith.constant 0 : i32
    %c0_i32_1 = arith.constant 0 : i32
    return %arg0, %c0_i32, %c0_i32_0 : i32, i32, i32
  }
  func.func @transform_4(%arg0: i32, %arg1: i32) -> (i32, i32) {
    %c0_i32 = arith.constant 0 : i32
    %c0_i32_0 = arith.constant 0 : i32
    %c0_i32_1 = arith.constant 0 : i32
    return %c0_i32, %c0_i32_0 : i32, i32
  }
  func.func @transform_5(%arg0: i32, %arg1: i32) -> (i32, i32) {
    %c0_i32 = arith.constant 0 : i32
    %c0_i32_0 = arith.constant 0 : i32
    %c0_i32_1 = arith.constant 0 : i32
    return %c0_i32, %c0_i32_0 : i32, i32
  }
  func.func @transform_6(%arg0: i32, %arg1: i32) -> (i32, i32, i32) {
    %c0_i32 = arith.constant 0 : i32
    %c0_i32_0 = arith.constant 0 : i32
    %c0_i32_1 = arith.constant 0 : i32
    return %arg1, %c0_i32, %c0_i32_0 : i32, i32, i32
  }
  func.func @transform_7(%arg0: i32, %arg1: i32) -> (i32, i32, i32) {
    %c0_i32 = arith.constant 0 : i32
    %c0_i32_0 = arith.constant 0 : i32
    %c0_i32_1 = arith.constant 0 : i32
    return %arg1, %c0_i32, %c0_i32_0 : i32, i32, i32
  }
  func.func @transform_8(%arg0: i32, %arg1: i32) -> (i32, i32, i32) {
    %c0_i32 = arith.constant 0 : i32
    %c0_i32_0 = arith.constant 0 : i32
    %c0_i32_1 = arith.constant 0 : i32
    return %arg1, %c0_i32, %c0_i32_0 : i32, i32, i32
  }
  func.func @transform_9(%arg0: i32, %arg1: i32) -> (i32, i32, i32) {
    %c0_i32 = arith.constant 0 : i32
    %c0_i32_0 = arith.constant 0 : i32
    %c0_i32_1 = arith.constant 0 : i32
    return %arg1, %c0_i32, %c0_i32_0 : i32, i32, i32
  }
  func.func @transform_10(%arg0: i32, %arg1: i32) -> (i32, i32, i32) {
    %c0_i32 = arith.constant 0 : i32
    %c0_i32_0 = arith.constant 0 : i32
    %c0_i32_1 = arith.constant 0 : i32
    return %arg1, %c0_i32, %c0_i32_0 : i32, i32, i32
  }
  func.func @transform_11(%arg0: i32, %arg1: i32) -> (i32, i32, i32) {
    %c0_i32 = arith.constant 0 : i32
    %c0_i32_0 = arith.constant 0 : i32
    %c0_i32_1 = arith.constant 0 : i32
    return %arg1, %c0_i32, %c0_i32_0 : i32, i32, i32
  }
  func.func @transform_12(%arg0: i32, %arg1: i32) -> (i32, i32, i32) {
    %c0_i32 = arith.constant 0 : i32
    %c0_i32_0 = arith.constant 0 : i32
    %c0_i32_1 = arith.constant 0 : i32
    return %arg1, %c0_i32, %c0_i32_0 : i32, i32, i32
  }
  func.func @transform_13(%arg0: i32, %arg1: i32) -> (i32, i32, i32) {
    %c0_i32 = arith.constant 0 : i32
    %c0_i32_0 = arith.constant 0 : i32
    %c0_i32_1 = arith.constant 0 : i32
    return %arg1, %c0_i32, %c0_i32_0 : i32, i32, i32
  }
  func.func @transform_14(%arg0: i32, %arg1: i32) -> (i32, i32, i32) {
    %c0_i32 = arith.constant 0 : i32
    %c0_i32_0 = arith.constant 0 : i32
    %c0_i32_1 = arith.constant 0 : i32
    return %arg1, %c0_i32, %c0_i32_0 : i32, i32, i32
  }
  func.func @transform_15(%arg0: i32, %arg1: i32) -> (i32, i32, i32) {
    %c0_i32 = arith.constant 0 : i32
    %c0_i32_0 = arith.constant 0 : i32
    %c0_i32_1 = arith.constant 0 : i32
    return %arg1, %c0_i32, %c0_i32_0 : i32, i32, i32
  }
  func.func @transform_16(%arg0: i32, %arg1: i32) -> (i32, i32, i32) {
    %c0_i32 = arith.constant 0 : i32
    %c0_i32_0 = arith.constant 0 : i32
    %c0_i32_1 = arith.constant 0 : i32
    return %arg1, %c0_i32, %c0_i32_0 : i32, i32, i32
  }
  func.func @transform_17(%arg0: i32, %arg1: i32) -> (i32, i32, i32) {
    %c0_i32 = arith.constant 0 : i32
    %c0_i32_0 = arith.constant 0 : i32
    %c0_i32_1 = arith.constant 0 : i32
    return %arg1, %c0_i32, %c0_i32_0 : i32, i32, i32
  }
  func.func @transform_18(%arg0: i32, %arg1: i32) -> (i32, i32) {
    %c0_i32 = arith.constant 0 : i32
    %c0_i32_0 = arith.constant 0 : i32
    %c0_i32_1 = arith.constant 0 : i32
    return %c0_i32, %c0_i32_0 : i32, i32
  }
  func.func @transform_19(%arg0: i32, %arg1: i32) -> (i32, i32) {
    %c0_i32 = arith.constant 0 : i32
    %c0_i32_0 = arith.constant 0 : i32
    %c0_i32_1 = arith.constant 0 : i32
    return %c0_i32, %c0_i32_0 : i32, i32
  }
  func.func @transform_20(%arg0: i32, %arg1: i32) -> (i32, i32) {
    %c0_i32 = arith.constant 0 : i32
    %c0_i32_0 = arith.constant 0 : i32
    %c0_i32_1 = arith.constant 0 : i32
    return %c0_i32, %c0_i32_0 : i32, i32
  }
  func.func @transform_21(%arg0: i32, %arg1: i32) -> (i32, i32) {
    %c0_i32 = arith.constant 0 : i32
    %c0_i32_0 = arith.constant 0 : i32
    %c0_i32_1 = arith.constant 0 : i32
    return %c0_i32, %c0_i32_0 : i32, i32
  }
  func.func @transform_22(%arg0: i32, %arg1: i32) -> (i32, i32, i32) {
    %c0_i32 = arith.constant 0 : i32
    %c0_i32_0 = arith.constant 0 : i32
    %c0_i32_1 = arith.constant 0 : i32
    return %arg0, %c0_i32, %c0_i32_0 : i32, i32, i32
  }
}

</mosaic_0001>

<bundles_post_ra>
// kernel: bert_classifier_forward.1
= control target key start
LH: loop header
LB: loop body
LE: loop exit
PB: predicated region body
PF: predicated region fallthrough
CT: control target
= control target key end

     0   :  { %s4587_s0 = inlined_call_operand.vmem [shape: f32[2,8,128], index: 0, kind: input, shape index: {}]   ;;  %s4588_s1 = inlined_call_operand.vmem [shape: f32[8,128], index: 1, kind: input, shape index: {}]   ;;  %s4589_s2 = inlined_call_operand.vmem [shape: f32[1,128], index: 2, kind: input, shape index: {}]   ;;  %s4590_s3 = inlined_call_operand.vmem [shape: f32[2,1,8], index: 3, kind: input, shape index: {}]   ;;  %s4591_s4 = inlined_call_operand.vmem [shape: f32[1,128], index: 4, kind: input, shape index: {}]   ;;  %s4592_s5 = inlined_call_operand.hbm [shape: f32[1,128], index: 5, kind: input, shape index: {}]   ;;  %s4593_s6 = inlined_call_operand.hbm [shape: bf16[2,128,384], index: 6, kind: input, shape index: {}]   ;;  %s4594_s7 = inlined_call_operand.vmem [shape: f32[2,1,384], index: 7, kind: input, shape index: {}]   ;;  %s4595_s8 = inlined_call_operand.hbm [shape: bf16[2,128,128], index: 8, kind: input, shape index: {}]   ;;  %s4596_s9 = inlined_call_operand.vmem [shape: f32[2,1,128], index: 9, kind: input, shape index: {}]   ;;  %s4597_s10 = inlined_call_operand.vmem [shape: f32[2,1,128], index: 10, kind: input, shape index: {}]   ;;  %s4598_s11 = inlined_call_operand.vmem [shape: f32[2,1,128], index: 11, kind: input, shape index: {}]   ;;  %s4599_s12 = inlined_call_operand.vmem [shape: bf16[2,128,256], index: 12, kind: input, shape index: {}]   ;;  %s4600_s13 = inlined_call_operand.vmem [shape: f32[2,1,256], index: 13, kind: input, shape index: {}]   ;;  %s4601_s14 = inlined_call_operand.hbm [shape: bf16[2,256,128], index: 14, kind: input, shape index: {}]   ;;  %s4602_s15 = inlined_call_operand.vmem [shape: f32[2,1,128], index: 15, kind: input, shape index: {}]   ;;  %s4603_s16 = inlined_call_operand.vmem [shape: f32[2,1,128], index: 16, kind: input, shape index: {}]   ;;  %s4604_s17 = inlined_call_operand.vmem [shape: f32[2,1,128], index: 17, kind: input, shape index: {}]   ;;  %s4605_s18 = inlined_call_operand.hbm [shape: bf16[128,128], index: 18, kind: input, shape index: {}]   ;;  %s4606_s19 = inlined_call_operand.hbm [shape: f32[1,128], index: 19, kind: input, shape index: {}]   ;;  %s4607_s20 = inlined_call_operand.hbm [shape: bf16[128,128], index: 20, kind: input, shape index: {}]   ;;  %s4608_s21 = inlined_call_operand.hbm [shape: f32[1,128], index: 21, kind: input, shape index: {}]   ;;  %s4609_s22 = inlined_call_operand.vmem [shape: f32[2,8,128], index: 22, kind: output, shape index: {}]  }
   0x1   :  { %4641 = sst [smem:[#allocation33_spill]] %s4587_s0 }
   0x2   :  { %4642 = sst [smem:[#allocation34_spill]] %s4588_s1 }
   0x3   :  { %4643 = sst [smem:[#allocation35_spill]] %s4589_s2 }
   0x4   :  { %4644 = sst [smem:[#allocation36_spill]] %s4590_s3 }
   0x5   :  { %4645 = sst [smem:[#allocation37_spill]] %s4591_s4 }
   0x6   :  { %4646 = sst [smem:[#allocation38_spill]] %s4592_s5 }
   0x7   :  { %4647 = sst [smem:[#allocation39_spill]] %s4593_s6 }
   0x8   :  { %4648 = sst [smem:[#allocation40_spill]] %s4594_s7 }
   0x9   :  { %4649 = sst [smem:[#allocation41_spill]] %s4595_s8 }
   0xa   :  { %4650 = sst [smem:[#allocation42_spill]] %s4596_s9 }
   0xb   :  { %4651 = sst [smem:[#allocation43_spill]] %s4597_s10 }
   0xc   :  { %4652 = sst [smem:[#allocation44_spill]] %s4598_s11 }
   0xd   :  { %4653 = sst [smem:[#allocation45_spill]] %s4599_s12 }
   0xe   :  { %4654 = sst [smem:[#allocation46_spill]] %s4600_s13 }
   0xf   :  { %4655 = sst [smem:[#allocation47_spill]] %s4601_s14 }
  0x10   :  { %4656 = sst [smem:[#allocation48_spill]] %s4602_s15 }
  0x11   :  { %4657 = sst [smem:[#allocation49_spill]] %s4603_s16 }
  0x12   :  { %4658 = sst [smem:[#allocation50_spill]] %s4604_s17 }
  0x13   :  { %4659 = sst [smem:[#allocation51_spill]] %s4605_s18 }
  0x14   :  { %4660 = sst [smem:[#allocation52_spill]] %s4606_s19 }
  0x15   :  { %4661 = sst [smem:[#allocation53_spill]] %s4607_s20 }
  0x16   :  { %4662 = sst [smem:[#allocation54_spill]] %s4608_s21 }
  0x17   :  { %4663 = sst [smem:[#allocation55_spill]] %s4609_s22 }
  0x18   :  { %27 = vsyncpa [#allocation4], 0 }
  0x19   :  { %28 = vsyncpa [#allocation6], 0 }
  0x1a   :  { %30 = vsyncpa [#allocation6 + $0x1], 0 }
  0x1b   :  { %31 = vsyncpa [#allocation9], 0 }
  0x1c   :  { %33 = vsyncpa [#allocation9 + $0x1], 0 }
  0x1d   :  { %34 = vsyncpa [#allocation12], 0 }
  0x1e   :  { %35 = vsyncpa [#allocation15], 0  ;;  %s3906_s3 = smov 0   ;;  %s3908_s28 = smov 0  }
  0x1f   :  { %s3910_s29 = smov 0   ;;  %s3912_s30 = smov 0  }
  0x20   :  { %s3914_s4 = smov 0   ;;  %s3916_s0 = smov 0  }
  0x21   :  { %s3918_s23 = smov 0   ;;  %s3920_s1 = smov 0  }
  0x22 LB: > { %4664 = sst [smem:[#allocation22_spill]] %s3745_s28  ;;  %s3771_s5 = smov [#allocation10]   ;;  %s3769_s1 = sphi %s3920_s1, %s41_s1   ;;  %s3765_s23 = sphi %s3918_s23, %s4739_s23   ;;  %s3761_s0 = sphi %s3916_s0, %s4738_s0   ;;  %s3757_s4 = sphi %s3914_s4, %s4737_s4   ;;  %s3753_s30 = sphi %s3912_s30, %s4736_s30   ;;  %s3749_s29 = sphi %s3910_s29, %s4735_s29   ;;  %s3745_s28 = sphi %s3908_s28, %s4734_s28   ;;  %s3741_s3 = sphi %s3906_s3, %s4733_s3  }
  0x23   : > { %4665 = sst [smem:[#allocation23_spill]] %s3749_s29  ;;  %s648_s24 = sshll.u32 %s3771_s5, 4  ;;  %s3955_s24 = int_to_ptr.vmem [resolvable:$true] %s648_s24 }
  0x24   : > { %4666 = sst [smem:[#allocation24_spill]] %s3753_s30  ;;  %s4612_s6 = sadd.s32 4294967295, %s3769_s1  }
  0x25   : > { %4667 = sst [smem:[#allocation25_spill]] %s3757_s4  ;;  %p2845_p0 = scmp.ge.s32.totalorder %s3769_s1, 1 }
  0x26   : > { %4668 = sst [smem:[#allocation26_spill]] %s3761_s0  ;;  %p3950_p1 = scmp.eq.s32.totalorder %s4612_s6, 0 }
  0x27   : > { %4669 = sst [smem:[#allocation27_spill]] %s3765_s23  ;;  %p616_p2 = scmp.lt.s32.totalorder %s3769_s1, 5 }
  0x28   : > { %4670 = sst [smem:[#allocation28_spill]] %s3769_s1  ;;  %s3772_s2 = smov [#allocation11]  }
  0x29   : > { %s4671_s25 = scalar_select %p3950_p1, 1, 0 }
  0x2a   : > { %p3957_p3 = pnand %p2845_p0, %p616_p2  ;;  %s662_s27 = sshll.u32 %s3772_s2, 4  ;;  %s3969_s27 = int_to_ptr.vmem [resolvable:$true] %s662_s27 }
  0x2b   : > { %s4674_s18 = sld [smem:[#allocation51_spill]] }
  0x2c   : > { %s4672_s26 = scalar_select %p3957_p3, 1, 0 }
  0x2d   : > { %p3211_p4 = pneg %p3957_p3 }
  0x2f   : > { %p3965_p5 = pnand %p3211_p4, %p3950_p1 }
  0x31   : > { %s4673_s5 = scalar_select %p3965_p5, 1, 0 }
  0x32   : > { %s3453_s17 = scalar_lea.hbm %s4674_s18, 1024  ;;  %p3979_p7 = pneg %p3965_p5 }
  0x33   : > { %p3454_p6 = scmp.ne.s32.totalorder %s4674_s18, %s3453_s17  ;;  %p3460_p10 = scmp.lt.u32.totalorder %s3453_s17, %s4674_s18 }
  0x34   : > { %s4675_s13 = scalar_select %p3979_p7, 1, 0 }
  0x35   : > { %p3456_p8 = pnand %p3979_p7, %p3454_p6 }
  0x37   : > { %p3457_p9 = pneg %p3456_p8 }
  0x39   : > { %p3462_p11 = pnand %p3460_p10, %p3457_p9 }
  0x3b   : > { %3465 = shalt.err (!%p3462_p11)
}
  0x3c   : > { %s3466_s15 = scalar_lea.vmem %s3955_s24, 1024  ;;  %p3474_p2 = scmp.lt.s32.totalorder %s3955_s24, %s3955_s24 }
  0x3d   : > { %p3467_p12 = scmp.ne.s32.totalorder %s3955_s24, %s3466_s15  ;;  %p3475_p4 = scmp.lt.s32.totalorder %s3466_s15, %s3466_s15 }
  0x3f   : > { %p3469_p13 = pnand %p3467_p12, %p3979_p7  ;;  %p3476_p6 = por %p3475_p4, %p3474_p2 }
  0x41   : > { %p3470_p0 = pneg %p3469_p13 }
  0x43   : > { %p3477_p8 = pnand %p3476_p6, %p3470_p0 }
  0x45   : > { %3480 = shalt.err (!%p3477_p8)
}
  0x46   : > { %s4613_s16 = smov 64   ;;  %s4615_s12 = smov 4  }
  0x47   : > { %3217 = dma.hbm_to_vmem [thread:$0]  (!%p3965_p5), %s4674_s18, 1024, %s3955_s24, [#allocation9], %s4613_s16, %s4613_s16, %s4615_s12  }
  0x48   : > { %s4676_s19 = sld [smem:[#allocation52_spill]] }
  0x4e   : > { %s3481_s15 = scalar_lea.hbm %s4676_s19, 16 }
  0x4f   : > { %p3482_p9 = scmp.ne.s32.totalorder %s4676_s19, %s3481_s15  ;;  %p3488_p12 = scmp.lt.u32.totalorder %s3481_s15, %s4676_s19 }
  0x51   : > { %p3484_p10 = pnand %p3482_p9, %p3979_p7 }
  0x53   : > { %p3485_p11 = pneg %p3484_p10 }
  0x55   : > { %p3490_p13 = pnand %p3488_p12, %p3485_p11 }
  0x57   : > { %3493 = shalt.err (!%p3490_p13)
}
  0x58   : > { %s3494_s24 = scalar_lea.vmem %s3969_s27, 16  ;;  %s3501_s7 = scalar_lea.vmem %s3969_s27, 32 }
  0x59   : > { %p3495_p0 = scmp.ne.s32.totalorder %s3969_s27, %s3494_s24  ;;  %p3502_p6 = scmp.lt.s32.totalorder %s3969_s27, %s3969_s27 }
  0x5a   : > { %p3503_p8 = scmp.lt.s32.totalorder %s3501_s7, %s3494_s24 }
  0x5b   : > { %p3497_p2 = pnand %p3495_p0, %p3979_p7 }
  0x5c   : > { %p3504_p9 = por %p3503_p8, %p3502_p6 }
  0x5d   : > { %p3498_p4 = pneg %p3497_p2 }
  0x5f   : > { %p3505_p10 = pnand %p3504_p9, %p3498_p4 }
  0x61   : > { %3508 = shalt.err (!%p3505_p10)
}
  0x62   : > { %3220 = dma.hbm_to_vmem [thread:$0]  (!%p3965_p5), %s4676_s19, 16, %s3969_s27, [#allocation12]  }
  0x63   : > { %s50_s11 = sadd.s32 1, %s3761_s0  ;;  %s53_s17 = sadd.s32 1, %s3765_s23 }
  0x64   : > { %p51_p11 = scmp.ge.s32.totalorder %s50_s11, 2  ;;  %s196_s22 = sadd.s32 1, %s3749_s29 }
  0x65   : > { %p203_p12 = scmp.ne.s32.totalorder %s3749_s29, %s3745_s28  ;;  %p204_p13 = scmp.eq.s32.totalorder %s3769_s1, 0 }
  0x66   : > { %s4741_s11 = smov (%p51_p11, %s50_s11), 0  ;;  %s4743_s17 = smov (!%p51_p11, %s53_s17), %s3765_s23 }
  0x67   : > { %4677 = sst [smem:[#allocation29_spill]] %s4741_s11  ;;  %s193_s6 = ssub.s32 %s3761_s0, %s4741_s11 }
  0x68   : > { %p205_p0 = por %p204_p13, %p203_p12  ;;  %p55_p2 = scmp.ge.s32.totalorder %s4743_s17, 2 }
  0x69   : > { %p194_p4 = scmp.eq.s32.totalorder %s193_s6, 0  ;;  %p209_p6 = scmp.ne.s32.totalorder %s3745_s28, %s3741_s3 }
  0x6a   : > { %p3242_p8 = scmp.lt.s32.totalorder %s3769_s1, 4  ;;  %s4745_s17 = smov (%p55_p2, %s4743_s17), 0 }
  0x6b   : > { %4678 = sst [smem:[#allocation30_spill]] %s4745_s17  ;;  %p4048_p9 = por %p3950_p1, %p209_p6 }
  0x6c   : > { %s4044_s27 = scalar_select %p194_p4, %s3749_s29, %s196_s22  }
  0x6d   : > { %s4680_s2 = scalar_select %p4048_p9, 1, 0 }
  0x6e   : > { %4679 = sst [smem:[#allocation31_spill]] %s4044_s27  ;;  %s4054_s24 = sand.u32 1, %s3749_s29  }
  0x6f   : > { %4681 = sst [smem:[#allocation32_spill]] %s4680_s2  ;;  %s3181_s7 = smul.u32 192, %s4054_s24 }
  0x70   : > { %p4057_p10 = pnand %p3242_p8, %p205_p0  ;;  %s3182_s3 = smul.u32 3072, %s3761_s0 }
  0x71   : > { %s4683_s22 = sld [smem:[#allocation39_spill]]  ;;  %s714_s12 = scalar_lea.vmem [#allocation5], %s3181_s7 }
  0x72   : > { %s4682_s9 = scalar_select %p4057_p10, 1, 0 }
  0x73   : > { %s721_s15 = sshll.u32 %s714_s12, 4  ;;  %s4684_s18 = sand.u32 1, %s3769_s1   ;;  %s4067_s15 = int_to_ptr.vmem [resolvable:$true] %s721_s15 }
  0x74   : > { %s4071_s19 = scalar_lea.sflag [#allocation6], %s4684_s18  ;;  %p4077_p12 = pneg %p4057_p10 }
  0x76   : > { %s4685_s11 = scalar_select %p4077_p12, 1, 0 }
  0x77   : > { %s4065_s16 = scalar_lea.hbm %s4683_s22, %s3182_s3  ;;  %s3514_s12 = scalar_lea.hbm %s4683_s22, 6144 }
  0x78   : > { %s3509_s17 = scalar_lea.hbm %s4065_s16, 3072  ;;  %p3515_p2 = scmp.lt.u32.totalorder %s4065_s16, %s4683_s22 }
  0x79   : > { %p3510_p11 = scmp.ne.s32.totalorder %s4065_s16, %s3509_s17  ;;  %p3516_p4 = scmp.lt.u32.totalorder %s3514_s12, %s3509_s17 }
  0x7a   : > { %p3518_p8 = scmp.lt.u32.totalorder %s3509_s17, %s4065_s16 }
  0x7b   : > { %p3512_p13 = pnand %p4077_p12, %p3510_p11  ;;  %p3517_p6 = por %p3516_p4, %p3515_p2 }
  0x7d   : > { %p3513_p0 = pneg %p3512_p13  ;;  %p3519_p9 = por %p3518_p8, %p3517_p6 }
  0x7f   : > { %p3520_p1 = pnand %p3519_p9, %p3513_p0 }
  0x81   : > { %3523 = shalt.err (!%p3520_p1)
}
  0x82   : > { %s3524_s18 = scalar_lea.vmem %s4067_s15, 3072  ;;  %s3775_s3 = smov [#allocation5]  }
  0x83   : > { %p3525_p11 = scmp.ne.s32.totalorder %s4067_s15, %s3524_s18  ;;  %s3529_s10 = sshll.u32 %s3775_s3, 4  ;;  %s3530_s10 = int_to_ptr.vmem [resolvable:$false] %s3529_s10 }
  0x84   : > { %s3531_s7 = scalar_lea.vmem %s3530_s10, 6144  ;;  %p3532_p5 = scmp.lt.s32.totalorder %s4067_s15, %s3530_s10 }
  0x85   : > { %p3527_p13 = pnand %p3525_p11, %p4077_p12  ;;  %p3533_p7 = scmp.lt.s32.totalorder %s3531_s7, %s3524_s18 }
  0x87   : > { %p3528_p3 = pneg %p3527_p13  ;;  %p3534_p2 = por %p3533_p7, %p3532_p5 }
  0x89   : > { %p3535_p4 = pnand %p3534_p2, %p3528_p3 }
  0x8b   : > { %3538 = shalt.err (!%p3535_p4)
}
  0x8c   : > { %s3776_s17 = smov 192   ;;  %s3777_s12 = smov 12  }
  0x8d   : > { %3230 = dma.hbm_to_vmem [thread:$0]  (!%p4057_p10), %s4065_s16, 3072, %s4067_s15, %s4071_s19, %s3776_s17, %s3776_s17, %s3777_s12  }
  0x8e   : > { %s3778_s6 = smov [#allocation3]   ;;  %s3779_s3 = smov [#allocation13]  }
  0x8f   : > { %s638_s22 = sshll.u32 %s3778_s6, 4  ;;  %s672_s23 = sshll.u32 %s3779_s3, 4  ;;  %s639_s22 = int_to_ptr.vmem [resolvable:$true] %s638_s22  ;;  %s673_s23 = int_to_ptr.vmem [resolvable:$true] %s672_s23 }
  0x90   : > { %s4686_s18 = sld [smem:[#allocation38_spill]]  ;;  %p4687_p3 = scmp.ne.s32.totalorder %s4675_s13, 0 }
  0x96   : > { %s3539_s7 = scalar_lea.hbm %s4686_s18, 16 }
  0x97   : > { %p3540_p1 = scmp.ne.s32.totalorder %s4686_s18, %s3539_s7  ;;  %p3546_p9 = scmp.lt.u32.totalorder %s3539_s7, %s4686_s18 }
  0x99   : > { %p3542_p5 = pnand %p3540_p1, %p4687_p3 }
  0x9b   : > { %p3543_p7 = pneg %p3542_p5 }
  0x9d   : > { %p3548_p0 = pnand %p3546_p9, %p3543_p7 }
  0x9f   : > { %3551 = shalt.err (!%p3548_p0)
}
  0xa0   : > { %s3552_s16 = scalar_lea.vmem %s639_s22, 16  ;;  %s3559_s27 = scalar_lea.vmem %s639_s22, 32 }
  0xa1   : > { %p3553_p6 = scmp.ne.s32.totalorder %s639_s22, %s3552_s16  ;;  %p3560_p13 = scmp.lt.s32.totalorder %s639_s22, %s639_s22 }
  0xa2   : > { %p3561_p2 = scmp.lt.s32.totalorder %s3559_s27, %s3552_s16 }
  0xa3   : > { %p3555_p8 = pnand %p3553_p6, %p4687_p3 }
  0xa4   : > { %p3562_p4 = por %p3561_p2, %p3560_p13 }
  0xa5   : > { %p3556_p11 = pneg %p3555_p8 }
  0xa7   : > { %p3563_p10 = pnand %p3562_p4, %p3556_p11 }
  0xa9   : > { %3566 = shalt.err (!%p3563_p10)
}
  0xaa   : > { %p4688_p1 = scmp.ne.s32.totalorder %s4673_s5, 0  ;;  %s4689_s20 = sld [smem:[#allocation53_spill]] }
  0xac   : > { %3214 = dma.hbm_to_vmem [thread:$0]  (!%p4688_p1), %s4686_s18, 16, %s639_s22, [#allocation4]  }
  0xb0   : > { %s3567_s15 = scalar_lea.hbm %s4689_s20, 1024 }
  0xb1   : > { %p3568_p5 = scmp.ne.s32.totalorder %s4689_s20, %s3567_s15  ;;  %p3574_p10 = scmp.lt.u32.totalorder %s3567_s15, %s4689_s20 }
  0xb3   : > { %p3570_p7 = pnand %p3568_p5, %p4687_p3 }
  0xb5   : > { %p3571_p9 = pneg %p3570_p7 }
  0xb7   : > { %p3576_p0 = pnand %p3574_p10, %p3571_p9 }
  0xb9   : > { %3579 = shalt.err (!%p3576_p0)
}
  0xba   : > { %s3580_s10 = scalar_lea.vmem %s673_s23, 1024  ;;  %p3588_p13 = scmp.lt.s32.totalorder %s673_s23, %s673_s23 }
  0xbb   : > { %p3581_p6 = scmp.ne.s32.totalorder %s673_s23, %s3580_s10  ;;  %p3589_p2 = scmp.lt.s32.totalorder %s3580_s10, %s3580_s10 }
  0xbd   : > { %p3583_p8 = pnand %p3581_p6, %p4687_p3  ;;  %p3590_p4 = por %p3589_p2, %p3588_p13 }
  0xbf   : > { %p3584_p11 = pneg %p3583_p8 }
  0xc1   : > { %p3591_p12 = pnand %p3590_p4, %p3584_p11 }
  0xc3   : > { %3594 = shalt.err (!%p3591_p12)
}
  0xc4   : > { %s4690_s22 = smov 4   ;;  %s4691_s7 = smov 64  }
  0xc5   : > { %3223 = dma.hbm_to_vmem [thread:$0]  (!%p4688_p1), %s4689_s20, 1024, %s673_s23, [#allocation12], %s4691_s7, %s4691_s7, %s4690_s22  }
  0xc6   : > { %s3780_s29 = smov [#allocation14]   ;;  %s2853_s4 = sshll.u32 %s4054_s24, 6 }
  0xc7   : > { %s686_s30 = sshll.u32 %s3780_s29, 4  ;;  %s4692_s21 = sld [smem:[#allocation54_spill]]  ;;  %s687_s30 = int_to_ptr.vmem [resolvable:$true] %s686_s30 }
  0xcd   : > { %s3595_s17 = scalar_lea.hbm %s4692_s21, 16 }
  0xce   : > { %p3596_p12 = scmp.ne.s32.totalorder %s4692_s21, %s3595_s17  ;;  %p3602_p9 = scmp.lt.u32.totalorder %s3595_s17, %s4692_s21 }
  0xd0   : > { %p3598_p5 = pnand %p3596_p12, %p4687_p3 }
  0xd2   : > { %p3599_p7 = pneg %p3598_p5 }
  0xd4   : > { %p3604_p10 = pnand %p3602_p9, %p3599_p7 }
  0xd6   : > { %3607 = shalt.err (!%p3604_p10)
}
  0xd7   : > { %s3608_s23 = scalar_lea.vmem %s687_s30, 16  ;;  %s3615_s16 = scalar_lea.vmem %s687_s30, 32 }
  0xd8   : > { %p3609_p0 = scmp.ne.s32.totalorder %s687_s30, %s3608_s23  ;;  %p3616_p11 = scmp.lt.s32.totalorder %s687_s30, %s687_s30 }
  0xd9   : > { %p3617_p13 = scmp.lt.s32.totalorder %s3615_s16, %s3608_s23 }
  0xda   : > { %p3611_p6 = pnand %p3609_p0, %p4687_p3 }
  0xdb   : > { %p3618_p2 = por %p3617_p13, %p3616_p11 }
  0xdc   : > { %p3612_p8 = pneg %p3611_p6 }
  0xde   : > { %p3619_p4 = pnand %p3618_p2, %p3612_p8 }
  0xe0   : > { %3622 = shalt.err (!%p3619_p4)
}
  0xe1   : > { %3226 = dma.hbm_to_vmem [thread:$0]  (!%p4688_p1), %s4692_s21, 16, %s687_s30, [#allocation15]  }
  0xe2   : > { %s2976_s2 = sshll.u32 %s3761_s0, 10  ;;  %s742_s15 = scalar_lea.vmem [#allocation7], %s2853_s4 }
  0xe3   : > { %s749_s17 = sshll.u32 %s742_s15, 4  ;;  %s4693_s8 = sld [smem:[#allocation41_spill]]  ;;  %s4165_s17 = int_to_ptr.vmem [resolvable:$true] %s749_s17 }
  0xe4   : > { %p4694_p12 = scmp.ne.s32.totalorder %s4685_s11, 0 }
  0xe9   : > { %s4163_s6 = scalar_lea.hbm %s4693_s8, %s2976_s2  ;;  %s3628_s4 = scalar_lea.hbm %s4693_s8, 2048 }
  0xea   : > { %s3623_s5 = scalar_lea.hbm %s4163_s6, 1024  ;;  %p3629_p1 = scmp.lt.u32.totalorder %s4163_s6, %s4693_s8 }
  0xeb   : > { %p3624_p3 = scmp.ne.s32.totalorder %s4163_s6, %s3623_s5  ;;  %p3630_p9 = scmp.lt.u32.totalorder %s3628_s4, %s3623_s5 }
  0xec   : > { %p3632_p0 = scmp.lt.u32.totalorder %s3623_s5, %s4163_s6 }
  0xed   : > { %p3626_p5 = pnand %p3624_p3, %p4694_p12  ;;  %p3631_p10 = por %p3630_p9, %p3629_p1 }
  0xef   : > { %p3627_p7 = pneg %p3626_p5  ;;  %p3633_p6 = por %p3632_p0, %p3631_p10 }
  0xf1   : > { %p3634_p8 = pnand %p3633_p6, %p3627_p7 }
  0xf3   : > { %3637 = shalt.err (!%p3634_p8)
}
  0xf4   : > { %s3638_s16 = scalar_lea.vmem %s4165_s17, 1024  ;;  %s3781_s27 = smov [#allocation7]  }
  0xf5   : > { %p3639_p11 = scmp.ne.s32.totalorder %s4165_s17, %s3638_s16  ;;  %s3643_s29 = sshll.u32 %s3781_s27, 4  ;;  %s3644_s29 = int_to_ptr.vmem [resolvable:$false] %s3643_s29 }
  0xf6   : > { %s3645_s2 = scalar_lea.vmem %s3644_s29, 2048  ;;  %p3646_p4 = scmp.lt.s32.totalorder %s4165_s17, %s3644_s29 }
  0xf7   : > { %p3641_p13 = pnand %p3639_p11, %p4694_p12  ;;  %p3647_p3 = scmp.lt.s32.totalorder %s3645_s2, %s3638_s16 }
  0xf9   : > { %p3642_p2 = pneg %p3641_p13  ;;  %p3648_p5 = por %p3647_p3, %p3646_p4 }
  0xfb   : > { %p3649_p1 = pnand %p3648_p5, %p3642_p2 }
  0xfd   : > { %3652 = shalt.err (!%p3649_p1)
}
  0xfe   : > { %p4695_p7 = scmp.ne.s32.totalorder %s4682_s9, 0  ;;  %s2856_s15 = sshll.u32 %s4054_s24, 7 }
  0xff   : > { %s2977_s13 = sshll.u32 %s3761_s0, 11  ;;  %s4696_s14 = sld [smem:[#allocation47_spill]] }
 0x100   : > { %3233 = dma.hbm_to_vmem [thread:$0]  (!%p4695_p7), %s4163_s6, 1024, %s4165_s17, %s4071_s19, %s4691_s7, %s4691_s7, %s4690_s22  }
 0x101   : > { %s796_s3 = scalar_lea.vmem [#allocation8], %s2856_s15  ;;  %s4697_s10 = sand.u32 1, %s3769_s1  }
 0x102   : > { %s803_s4 = sshll.u32 %s796_s3, 4  ;;  %s4203_s23 = scalar_lea.sflag [#allocation9], %s4697_s10  ;;  %s4199_s4 = int_to_ptr.vmem [resolvable:$true] %s803_s4 }
 0x105   : > { %s4197_s30 = scalar_lea.hbm %s4696_s14, %s2977_s13  ;;  %s3658_s17 = scalar_lea.hbm %s4696_s14, 4096 }
 0x106   : > { %s3653_s16 = scalar_lea.hbm %s4197_s30, 2048  ;;  %p3659_p6 = scmp.lt.u32.totalorder %s4197_s30, %s4696_s14 }
 0x107   : > { %p3654_p9 = scmp.ne.s32.totalorder %s4197_s30, %s3653_s16  ;;  %p3660_p8 = scmp.lt.u32.totalorder %s3658_s17, %s3653_s16 }
 0x108   : > { %p3662_p13 = scmp.lt.u32.totalorder %s3653_s16, %s4197_s30 }
 0x109   : > { %p3656_p10 = pnand %p3654_p9, %p4694_p12  ;;  %p3661_p11 = por %p3660_p8, %p3659_p6 }
 0x10b   : > { %p3657_p0 = pneg %p3656_p10  ;;  %p3663_p2 = por %p3662_p13, %p3661_p11 }
 0x10d   : > { %p3664_p4 = pnand %p3663_p2, %p3657_p0 }
 0x10f   : > { %3667 = shalt.err (!%p3664_p4)
}
 0x110   : > { %s3668_s29 = scalar_lea.vmem %s4199_s4, 2048  ;;  %s3782_s2 = smov [#allocation8]  }
 0x111   : > { %p3669_p3 = scmp.ne.s32.totalorder %s4199_s4, %s3668_s29  ;;  %s3673_s15 = sshll.u32 %s3782_s2, 4  ;;  %s3674_s15 = int_to_ptr.vmem [resolvable:$false] %s3673_s15 }
 0x112   : > { %s3675_s13 = scalar_lea.vmem %s3674_s15, 4096  ;;  %p3676_p9 = scmp.lt.s32.totalorder %s4199_s4, %s3674_s15 }
 0x113   : > { %p3671_p5 = pnand %p3669_p3, %p4694_p12  ;;  %p3677_p10 = scmp.lt.s32.totalorder %s3675_s13, %s3668_s29 }
 0x115   : > { %p3672_p1 = pneg %p3671_p5  ;;  %p3678_p6 = por %p3677_p10, %p3676_p9 }
 0x117   : > { %p3679_p8 = pnand %p3678_p6, %p3672_p1 }
 0x119   : > { %3682 = shalt.err (!%p3679_p8)
}
 0x11a   : > { %3236 = dma.hbm_to_vmem [thread:$0]  (!%p4695_p7), %s4197_s30, 2048, %s4199_s4, %s4203_s23, %s4691_s7, %s4691_s7, %s4690_s22  }
 0x11b   : > { %p4698_p12 = scmp.ne.s32.totalorder %s4672_s26, 0 }
 0x11c   : > { %p4699_p0 = scmp.ne.s32.totalorder (!%p4698_p12), %s4671_s25, 0 }
 0x11d   : > { %833 = sbr.rel (%p4698_p12) target bundleno = 3652 (0xe44), region = 108 }
 0x124   : > { %3716 = dma.done.wait (%p4699_p0), [#allocation4], 16  }
 0x125   : > { %3718 = vsyncadd (%p4699_p0), [#allocation4], 4294967280  ;;  %s4700_s11 = sadd.s32 4294967295, %s3769_s1   ;;  %s4701_s9 = sld [smem:[#allocation32_spill]] }
 0x126   : > { %s839_s12 = sand.u32 1, %s4700_s11   ;;  %s841_s5 = sand.u32 1, %s3745_s28  }
 0x127   : > { %s3183_s3 = smul.u32 192, %s841_s5  ;;  %s840_s10 = scalar_lea.sflag [#allocation6], %s839_s12 }
 0x129   : > { %s4239_s16 = scalar_lea.vmem [#allocation5], %s3183_s3 }
 0x12b   : > { %p4702_p7 = scmp.ne.s32.totalorder %s4701_s9, 0 }
 0x12d   : > { %3720 = dma.done.wait (%p4702_p7), %s840_s10, 4096  }
 0x12e   : > { %3722 = vsyncadd (%p4702_p7), %s840_s10, 4294963200  ;;  %s2861_s26 = sshll.u32 %s841_s5, 6  ;;  %s2862_s22 = sshll.u32 %s841_s5, 7 }
 0x12f   : > { %s4245_s7 = scalar_lea.vmem [#allocation7], %s2861_s26  ;;  %s858_s30 = scalar_lea.sflag [#allocation9], %s839_s12 }
 0x130   : > { %s4247_s4 = scalar_lea.vmem [#allocation8], %s2862_s22 }
 0x131   : > { %3724 = dma.done.wait (%p4702_p7), %s858_s30, 2048  }
 0x132   : > { %3726 = vsyncadd (%p4702_p7), %s858_s30, 4294965248 }
 0x133   : > { %3728 = dma.done.wait (%p4699_p0), [#allocation9], 1024  }
 0x134   : > { %3730 = vsyncadd (%p4699_p0), [#allocation9], 4294966272 }
 0x135   : > { %3732 = dma.done.wait (%p4699_p0), [#allocation12], 1040  }
 0x136   : > { %3734 = vsyncadd (%p4699_p0), [#allocation12], 4294966256 }
 0x137   : > { %3736 = dma.done.wait (%p4699_p0), [#allocation15], 16  }
 0x138   : > { %3738 = vsyncadd (%p4699_p0), [#allocation15], 4294967280  ;;  %s4703_s23 = sld [smem:[#allocation25_spill]]  ;;  %s4704_s19 = sld [smem:[#allocation24_spill]] }
 0x139   : > { %s4706_s13 = sld [smem:[#allocation33_spill]]  ;;  %s4709_s20 = sld [smem:[#allocation40_spill]] }
 0x13a   : > { %s4711_s28 = sld [smem:[#allocation45_spill]]  ;;  %s4712_s26 = sld [smem:[#allocation46_spill]] }
 0x13b   : > { %s4714_s17 = sld [smem:[#allocation49_spill]]  ;;  %s4715_s10 = sld [smem:[#allocation50_spill]] }
 0x13e   : > { %p985_p11 = scmp.lt.s32.totalorder %s4703_s23, 1  ;;  %p992_p13 = scmp.lt.s32.totalorder %s4704_s19, 1 }
 0x13f   : > { %p2872_p2 = scmp.ne.s32.totalorder %s4704_s19, 0 }
 0x140   : > { %s4747_s23 = smov (!%p985_p11, %s4703_s23), 1  ;;  %s4717_s3 = sld [smem:[#allocation34_spill]] (!%p2872_p2)  ;;  %v2875_v18 = vld [vmem:[#allocation3] ss:$0 sm:$0xff] (!%p2872_p2) }
 0x141   : > { %s4271_s24 = scalar_select %p992_p13, %s4704_s19, 1 }
 0x142   : > { %s2867_s25 = sshll.u32 %s4747_s23, 3  ;;  %s4718_s30 = sld [smem:[#allocation35_spill]] (!%p2872_p2) }
 0x143   : > { %s988_s11 = scalar_lea.vmem %s4706_s13, %s2867_s25  ;;  %s3184_s9 = smul.u32 3, %s4271_s24 }
 0x144   : > { %s2978_s2 = sshll.u32 %s4271_s24, 7  ;;  %s2870_s15 = sshll.u32 %s4271_s24, 1  ;;  %v1032_v0 = vld [vmem:[%s988_s11] sm:$0xff] (!%p2872_p2) }
 0x145   : > { %s4293_s21 = scalar_lea.vmem %s4709_s20, %s3184_s9  ;;  %s4304_s12 = scalar_lea.vmem %s4711_s28, %s2978_s2 }
 0x146   : > { %s4309_s22 = scalar_lea.vmem %s4712_s26, %s2870_s15  ;;  %s4713_s20 = sld [smem:[#allocation48_spill]]  ;;  %v1033_v1 = vld [vmem:[%s4717_s3] sm:$0xff] (!%p2872_p2) }
 0x147   : > { %s1019_s6 = scalar_lea.vmem %s4714_s17, %s4271_s24  ;;  %s1022_s1 = scalar_lea.vmem %s4715_s10, %s4271_s24  ;;  %v1034_v3 = vadd.f32 (!%p2872_p2), %v1033_v1, %v1032_v0 }
 0x148   : > { %s4716_s2 = sld [smem:[#allocation55_spill]]  ;;  %1031 = sbr.rel (%p2872_p2) target bundleno = 503 (0x1f7), region = 144  ;;  %v2873_v2 = vld [vmem:[%s4718_s30] ss:$0 sm:$0xff] (!%p2872_p2) }
 0x149   : > { %v1042_v4 = vadd.f32 (!%p2872_p2), %v2873_v2, %v1034_v3  ;;  %s4719_s29 = sld [smem:[#allocation37_spill]] (!%p2872_p2) }
 0x14b   : > { %1045 = vadd.xlane.f32.xlu0 (!%p2872_p2), %v1042_v4  ;;  %v1049_v5 = vmul.f32 (!%p2872_p2), %v1042_v4, %v1042_v4 }
 0x14c   : > { %s1016_s18 = scalar_lea.vmem %s4713_s20, %s4271_s24 }
 0x14e   : > { %s4326_s13 = scalar_lea.vmem %s4716_s2, %s2867_s25 }
 0x14f   : > { %1050 = vadd.xlane.f32.xlu0 %v1049_v5  ;;  %v2874_v16 = vld [vmem:[%s4719_s29] ss:$0 sm:$0xff] }
 0x1d8   : > { %v1046_v6 = vpop.xlane.xlu0 %1045 }
 0x1d9   : > { %v1048_v7 = vmul.f32 0.0078125, %v1046_v6 }
 0x1db   : > { %v1053_v9 = vmul.f32 %v1048_v7, %v1048_v7  ;;  %v1056_v14 = vsub.f32 %v1042_v4, %v1048_v7 }
 0x1dc   : > { %v1051_v8 = vpop.xlane.xlu0 %1050 }
 0x1dd   : > { %v1052_v10 = vmul.f32 0.0078125, %v1051_v8 }
 0x1df   : > { %v1054_v11 = vsub.f32 %v1052_v10, %v1053_v9 }
 0x1e1   : > { %v1055_v12 = vmax.f32 %v1054_v11, 0.0 }
 0x1e3   : > { %v1057_v13 = vadd.f32 1e-12, %v1055_v12 }
 0x1e5   : > { %3329 = vrsqrt.f32 %v1057_v13 }
 0x1ef   : > { %v3330_v15 = vpop.eup %3329 }
 0x1f0   : > { %v1059_v17 = vmul.f32 %v3330_v15, %v1056_v14 }
 0x1f2   : > { %v1066_v19 = vmul.f32 %v2874_v16, %v1059_v17 }
 0x1f4   : > { %v1073_v20 = vadd.f32 %v2875_v18, %v1066_v19 }
 0x1f6   : > { %1074 = vst [vmem:[#allocation2] sm:$0xff] %v1073_v20 }
 0x1f7 PF: > { %v3331_v21 = vld [vmem:[%s4239_s16 + $0x4] ss:$12 sps:$4 sm:$0xff]   ;;  %v3333_v22 = vld [vmem:[%s4239_s16] ss:$12 sps:$4 sm:$0xff]   ;;  %v3783_v23 = vmov 0   ;;  %v3784_v24 = vmov 0.0   ;;  %v1111_v49 = vlaneseq }
 0x1f8   : > { %1286 = vmatprep.mubr.bf16.mxu0 %v3783_v23  ;;  %3053 = vmatprep.subr.bf16.mxu1 %v3784_v24  ;;  %v3334_v25 = vld [vmem:[%s4239_s16 + $0x1c] ss:$12 sps:$4 sm:$0xff]   ;;  %v3336_v26 = vld [vmem:[%s4239_s16 + $0x18] ss:$12 sps:$4 sm:$0xff]   ;;  %v3337_v27 = vld [vmem:[%s4239_s16 + $0x34] ss:$12 sps:$4 sm:$0xff]  }
 0x1f9   : > { %1254 = vmatprep.subr.bf16.mxu0 %v3331_v21  ;;  %v3339_v28 = vld [vmem:[%s4239_s16 + $0x30] ss:$12 sps:$4 sm:$0xff]   ;;  %v3340_v29 = vld [vmem:[%s4239_s16 + $0x4c] ss:$12 sps:$4 sm:$0xff]   ;;  %v3342_v30 = vld [vmem:[%s4239_s16 + $0x48] ss:$12 sps:$4 sm:$0xff]  }
 0x1fa   : > { %1255 = vmatpush1.bf16.msra.mxu0 %v3333_v22  ;;  %v3355_v31 = vld [vmem:[%s4239_s16 + $0x8] ss:$12 sps:$4 sm:$0xff]   ;;  %v3343_v32 = vld [vmem:[%s4239_s16 + $0x64] ss:$12 sps:$4 sm:$0xff]   ;;  %v3356_v33 = vld [vmem:[%s4239_s16 + $0x20] ss:$12 sps:$4 sm:$0xff]  }
 0x1fb   : > { %1256 = vmatprep.subr.bf16.mxu0 %v3334_v25  ;;  %3054 = vmatpush3.bf16.msra.mxu1 %v3355_v31  ;;  %v3345_v34 = vld [vmem:[%s4239_s16 + $0x60] ss:$12 sps:$4 sm:$0xff]   ;;  %v3346_v35 = vld [vmem:[%s4239_s16 + $0x7c] ss:$12 sps:$4 sm:$0xff]   ;;  %v3348_v36 = vld [vmem:[%s4239_s16 + $0x78] ss:$12 sps:$4 sm:$0xff]  }
 0x1fc   : > { %3055 = vmatprep.subr.bf16.mxu1 %v3784_v24  ;;  %v3357_v37 = vld [vmem:[%s4239_s16 + $0x38] ss:$12 sps:$4 sm:$0xff]   ;;  %v3349_v38 = vld [vmem:[%s4239_s16 + $0x94] ss:$12 sps:$4 sm:$0xff]   ;;  %v3358_v39 = vld [vmem:[%s4239_s16 + $0x50] ss:$12 sps:$4 sm:$0xff]  }
 0x1fd   : > { %v3351_v40 = vld [vmem:[%s4239_s16 + $0x90] ss:$12 sps:$4 sm:$0xff]   ;;  %v3352_v41 = vld [vmem:[%s4239_s16 + $0xac] ss:$12 sps:$4 sm:$0xff]   ;;  %v3359_v42 = vld [vmem:[%s4239_s16 + $0x68] ss:$12 sps:$4 sm:$0xff]  }
 0x1fe   : > { %1257 = vmatpush1.bf16.msra.mxu0 %v3336_v26  ;;  %v3354_v43 = vld [vmem:[%s4239_s16 + $0xa8] ss:$12 sps:$4 sm:$0xff]   ;;  %v3360_v45 = vld [vmem:[%s4239_s16 + $0x80] ss:$12 sps:$4 sm:$0xff]   ;;  %v3361_v47 = vld [vmem:[%s4239_s16 + $0x98] ss:$12 sps:$4 sm:$0xff]  }
 0x1ff   : > { %1258 = vmatprep.subr.bf16.mxu0 %v3337_v27  ;;  %3056 = vmatpush3.bf16.msra.mxu1 %v3356_v33  ;;  %v4364_v44 = vld [vmem:[#allocation2] sm:$0xff]  ;;  %vm3785_vm0 = vmmov 0   ;;  %v4383_v50 = vshrl.u32 %v1111_v49, 7  ;;  %vm1341_vm1 = vcmask 261120   ;;  %s3788_s11 = smov 32   ;;  %vm1412_vm2 = vcmask 1043456  }
 0x200   : > { %3057 = vmatprep.subr.bf16.mxu1 %v3784_v24  ;;  %v1076_v46 = vpack.c.bf16 %v4364_v44, %v4364_v44  ;;  %v3362_v48 = vld [vmem:[%s4239_s16 + $0xb0] ss:$12 sps:$4 sm:$0xff]   ;;  %3069 = vmatprep.mubr.msk.bf16.mxu1 %vm3785_vm0, %v3784_v24  ;;  %v1109_v52 = vld [vmem:[%s4293_s21] sm:$0x7]  ;;  %s3786_s16 = smov 96   ;;  %s3787_s21 = smov 64  }
 0x201   : > { %v1117_v51 = vsub.s32 1, %v4383_v50  ;;  %v4388_v53 = vsub.s32 0, %v4383_v50  ;;  %v1121_v1 = vsub.s32 2, %v4383_v50  ;;  %s4720_s20 = sld [smem:[#allocation36_spill]]  ;;  %vm1396_vm3 = vcmask 64512   ;;  %s4722_s17 = sld [smem:[#allocation42_spill]] }
 0x202   : > { %1259 = vmatpush1.bf16.msra.mxu0 %v3339_v28  ;;  %vm1808_vm4 = vcmask 523264   ;;  %vm1810_vm5 = vcmask 785408   ;;  %s4724_s28 = sld [smem:[#allocation43_spill]]  ;;  %s4726_s3 = sld [smem:[#allocation44_spill]] }
 0x203   : > { %1260 = vmatprep.subr.bf16.mxu0 %v3340_v29  ;;  %3058 = vmatpush3.bf16.msra.mxu1 %v3357_v37  ;;  %v1118_v54 = vrot.slane %v1109_v52, %v1117_v51  ;;  %v1114_v55 = vrot.slane %v1109_v52, %v4388_v53  ;;  %v1122_v2 = vrot.slane %v1109_v52, %v1121_v1 }
 0x204   : > { %3059 = vmatprep.subr.bf16.mxu1 %v3784_v24 }
 0x206   : > { %1261 = vmatpush1.bf16.msra.mxu0 %v3342_v30 }
 0x207   : > { %1262 = vmatprep.subr.bf16.mxu0 %v3343_v32  ;;  %3060 = vmatpush3.bf16.msra.mxu1 %v3358_v39  ;;  %s4721_s9 = scalar_lea.vmem %s4720_s20, %s4747_s23  ;;  %s4723_s27 = scalar_lea.vmem %s4722_s17, %s4271_s24 }
 0x208   : > { %3061 = vmatprep.subr.bf16.mxu1 %v3784_v24  ;;  %v1335_v10 = vld [vmem:[%s4721_s9] sm:$0x1]  ;;  %s4725_s2 = scalar_lea.vmem %s4724_s28, %s4271_s24  ;;  %s4727_s26 = scalar_lea.vmem %s4726_s3, %s4271_s24 }
 0x209   : > { %v2900_v11 = vadd.f32 -1.0, %v1335_v10 }
 0x20a   : > { %1263 = vmatpush1.bf16.msra.mxu0 %v3345_v34 }
 0x20b   : > { %1264 = vmatprep.subr.bf16.mxu0 %v3346_v35  ;;  %3062 = vmatpush3.bf16.msra.mxu1 %v3359_v42  ;;  %v1337_v12 = vmul.f32 1e+09, %v2900_v11 }
 0x20c   : > { %3063 = vmatprep.subr.bf16.mxu1 %v3784_v24 }
 0x20d   : > { %v4415_v13 = vrot.slane %v1337_v12, %v4388_v53 }
 0x20e   : > { %1265 = vmatpush1.bf16.msra.mxu0 %v3348_v36 }
 0x20f   : > { %1266 = vmatprep.subr.bf16.mxu0 %v3349_v38  ;;  %3064 = vmatpush3.bf16.msra.mxu1 %v3360_v45 }
 0x210   : > { %3065 = vmatprep.subr.bf16.mxu1 %v3784_v24 }
 0x212   : > { %1267 = vmatpush1.bf16.msra.mxu0 %v3351_v40 }
 0x213   : > { %1268 = vmatprep.subr.bf16.mxu0 %v3352_v41  ;;  %3066 = vmatpush3.bf16.msra.mxu1 %v3361_v47 }
 0x214   : > { %3067 = vmatprep.subr.bf16.mxu1 %v3784_v24 }
 0x216   : > { %1269 = vmatpush1.bf16.msra.mxu0 %v3354_v43 }
 0x217   : > { %3097 = vmatprep.subr.bf16.mxu0 %v3784_v24  ;;  %3068 = vmatpush3.bf16.msra.mxu1 %v3362_v48 }
 0x218   : > { %3073 = vmatprep.subr.bf16.mxu1 %v3784_v24 }
 0x219   : > { %1287 = vmatmul.mubr.bf16.vlgmr.msra.gmra.mrb[0].mxu0 %v1076_v46 }
 0x21a   : > { %3099 = vmatprep.mubr.msk.bf16.mxu0 %vm3785_vm0, %v3784_v24  ;;  %3070 = vmatmul.mubr.bf16.vlgmr.msra.gmra.mrb[0].mxu1 %v1076_v46 }
 0x21b   : > { %3075 = vmatprep.mubr.msk.bf16.mxu1 %vm3785_vm0, %v3784_v24 }
 0x2ec   : > { %v1288_v56 = vpop.f32.mrb[0].mxu0 }
 0x2ed   : > { %v1290_v57 = vpop.f32.mrb[1].mxu0  ;;  %v1289_v61 = vadd.f32 %v1288_v56, %v1114_v55  ;;  %v1329_v3 = vpop.f32.mrb[0].mxu1 }
 0x2ee   : > { %v1291_v58 = vadd.f32 %v1290_v57, %v1118_v54  ;;  %v1292_v59 = vpop.f32.mrb[2].mxu0  ;;  %v1330_v4 = vadd.f32 %v1329_v3, %v1122_v2  ;;  %v3071_v5 = vpop.f32.mrb[1].mxu1 }
 0x2ef   : > { %v1293_v60 = vpop.f32.mrb[3].mxu0  ;;  %v1338_v0 = vpack.c.bf16 %v1289_v61, %v1289_v61  ;;  %v1332_v6 = vpop.f32.mrb[2].mxu1 }
 0x2f0   : > { %v1339_v62 = vpack.c.bf16 %v1291_v58, %v1291_v58  ;;  %v4404_v7 = vpack.c.bf16 %v1330_v4, %v1330_v4  ;;  %v3072_v8 = vpop.f32.mrb[3].mxu1 }
 0x2f2   : > { %1460 = vrot.lane.b32.xlu1 %v1339_v62, %s3786_s16  ;;  %v1346_v63 = vsel %vm1341_vm1, %v1339_v62, 0  ;;  %v1414_v9 = vsel %vm1412_vm2, %v4404_v7, 0 }
 0x2f3   : > { %3074 = vmatpush3.bf16.xpose.msra.mxu1 %v1346_v63 }
 0x2f4   : > { %3079 = vmatprep.subr.bf16.mxu1 %v3784_v24 }
 0x2f6   : > { %1457 = vrot.lane.b32.xlu1 %v1338_v0, %s3786_s16 }
 0x2fa   : > { %1571 = vrot.lane.b32.xlu1 %v1338_v0, %s3787_s21  ;;  %3076 = vmatmul.mubr.msk.bf16.vlgmr.msra.gmra.mrb[4].mxu1 %vm1341_vm1, %v1338_v0 }
 0x2fb   : > { %3081 = vmatprep.mubr.msk.bf16.mxu1 %vm3785_vm0, %v3784_v24  ;;  %3080 = vmatpush3.bf16.msra.mxu1 %v1414_v9 }
 0x2fc   : > { %3085 = vmatprep.subr.bf16.mxu1 %v3784_v24 }
 0x2fe   : > { %1685 = vrot.lane.b32.xlu1 %v1339_v62, %s3788_s11 }
 0x302   : > { %1683 = vrot.lane.b32.xlu1 %v1338_v0, %s3788_s11 }
 0x364   : > { %v1461_v28 = vpop.permute.xlu1 %1460 }
 0x365   : > { %v1466_v39 = vsel %vm1341_vm1, %v1461_v28, 0 }
 0x368   : > { %v1458_v29 = vpop.permute.xlu1 %1457 }
 0x36c   : > { %v1572_v31 = vpop.permute.xlu1 %1571 }
 0x370   : > { %v1686_v34 = vpop.permute.xlu1 %1685 }
 0x371   : > { %v1691_v37 = vsel %vm1341_vm1, %v1686_v34, 0 }
 0x374   : > { %v1684_v40 = vpop.permute.xlu1 %1683 }
 0x3cd   : > { %v1382_v14 = vpop.f32.mrb[4].mxu1 }
 0x3ce   : > { %v1388_v15 = vmul.f32 0.17677669, %v1382_v14  ;;  %v3077_v16 = vpop.f32.mrb[5].mxu1 }
 0x3cf   : > { %v1385_v17 = vpop.f32.mrb[6].mxu1 }
 0x3d0   : > { %v3078_v18 = vpop.f32.mrb[7].mxu1  ;;  %v1395_v19 = vadd.f32 %v4415_v13, %v1388_v15 }
 0x3d2   : > { %v1397_v20 = vsel %vm1396_vm3, %v1395_v19, -inf }
 0x3d3   : > { %1398 = vmax.xlane.f32.xlu0 %v1397_v20 }
 0x460   : > { %v1399_v21 = vpop.xlane.xlu0 %1398 }
 0x461   : > { %v1400_v22 = vsub.f32 %v1395_v19, %v1399_v21 }
 0x463   : > { %v1401_v25 = vmul.f32 1.442695, %v1400_v22 }
 0x465   : > { %3411 = vpow2.f32 %v1401_v25 }
 0x46f   : > { %v3412_v26 = vpop.eup %3411 }
 0x470   : > { %v1403_v27 = vsel %vm1396_vm3, %v3412_v26, 0.0 }
 0x471   : > { %1404 = vadd.xlane.f32.xlu0 %v1403_v27 }
 0x487   : > { %1573 = vrot.lane.b32.xlu0 %v1339_v62, %s3787_s21 }
 0x4fe   : > { %v1405_v30 = vpop.xlane.xlu0 %1404 }
 0x4ff   : > { %3413 = vrcp.f32 %v1405_v30 }
 0x502   : > { %v1574_v32 = vpop.permute.xlu0 %1573 }
 0x503   : > { %v1579_v33 = vsel %vm1341_vm1, %v1574_v32, 0 }
 0x504   : > { %3098 = vmatpush3.bf16.xpose.msra.mxu0 %v1579_v33 }
 0x505   : > { %3109 = vmatprep.subr.bf16.mxu0 %v3784_v24 }
 0x509   : > { %v3414_v35 = vpop.eup %3413 }
 0x50a   : > { %v1407_v36 = vmul.f32 %v3414_v35, %v3412_v26 }
 0x50b   : > { %3100 = vmatmul.mubr.msk.bf16.vlgmr.msra.gmra.mrb[4].mxu0 %vm1341_vm1, %v1572_v31 }
 0x50c   : > { %3110 = vmatpush3.bf16.xpose.msra.mxu0 %v1691_v37  ;;  %v1408_v38 = vpack.c.bf16 %v1407_v36, %v1407_v36  ;;  %3111 = vmatprep.mubr.msk.bf16.mxu0 %vm3785_vm0, %v3784_v24 }
 0x50d   : > { %3121 = vmatprep.subr.bf16.mxu0 %v3784_v24 }
 0x50e   : > { %3082 = vmatmul.mubr.msk.bf16.vlgmr.msra.gmra.mrb[8].mxu1 %vm1396_vm3, %v1408_v38 }
 0x50f   : > { %3086 = vmatpush3.bf16.xpose.msra.mxu1 %v1466_v39  ;;  %3087 = vmatprep.mubr.msk.bf16.mxu1 %vm3785_vm0, %v3784_v24 }
 0x510   : > { %3091 = vmatprep.subr.bf16.mxu1 %v3784_v24 }
 0x513   : > { %3112 = vmatmul.mubr.msk.bf16.vlgmr.msra.gmra.mrb[8].mxu0 %vm1341_vm1, %v1684_v40 }
 0x514   : > { %3137 = vmatprep.mubr.msk.bf16.mxu0 %vm3785_vm0, %v3784_v24 }
 0x516   : > { %3088 = vmatmul.mubr.msk.bf16.vlgmr.msra.gmra.mrb[12].mxu1 %vm1341_vm1, %v1458_v29 }
 0x517   : > { %3093 = vmatprep.mubr.msk.bf16.mxu1 %vm3785_vm0, %v3784_v24 }
 0x5de   : > { %v1615_v41 = vpop.f32.mrb[4].mxu0 }
 0x5df   : > { %v1621_v42 = vmul.f32 0.17677669, %v1615_v41  ;;  %v3101_v43 = vpop.f32.mrb[5].mxu0  ;;  %v3363_v41 = vld [vmem:[%s4245_s7] sm:$0xff]  }
 0x5e0   : > { %v1618_v45 = vpop.f32.mrb[6].mxu0  ;;  %3122 = vmatpush3.bf16.msra.mxu0 %v3363_v41  ;;  %v3365_v43 = vld [vmem:[%s4245_s7 + $0x10] sm:$0xff]  }
 0x5e1   : > { %v4439_v46 = vpop.f32.mrb[8].mxu1  ;;  %v3102_v47 = vpop.f32.mrb[7].mxu0  ;;  %v1622_v48 = vadd.f32 %v1621_v42, %v4415_v13  ;;  %v3364_v42 = vld [vmem:[%s4245_s7 + $0x8] sm:$0xff]   ;;  %3123 = vmatprep.subr.bf16.mxu0 %v3784_v24  ;;  %v3366_v45 = vld [vmem:[%s4245_s7 + $0x18] sm:$0xff]   ;;  %v2918_v41 = vld [vmem:[%s4725_s2] ss:$0 sm:$0xff] }
 0x5e2   : > { %v3083_v49 = vpop.f32.mrb[9].mxu1  ;;  %v3367_v47 = vld [vmem:[%s4245_s7 + $0x20] sm:$0xff]  }
 0x5e3   : > { %v1453_v52 = vpop.f32.mrb[10].mxu1  ;;  %v1623_v54 = vsel %vm1396_vm3, %v1622_v48, -inf }
 0x5e4   : > { %1624 = vmax.xlane.f32.xlu0 %v1623_v54  ;;  %v3084_v55 = vpop.f32.mrb[11].mxu1  ;;  %3124 = vmatpush3.bf16.msra.mxu0 %v3364_v42 }
 0x5e5   : > { %3125 = vmatprep.subr.bf16.mxu0 %v3784_v24 }
 0x5e6   : > { %v1727_v56 = vpop.f32.mrb[8].mxu0 }
 0x5e7   : > { %v3113_v57 = vpop.f32.mrb[9].mxu0  ;;  %v1733_v61 = vmul.f32 0.17677669, %v1727_v56  ;;  %v3370_v56 = vld [vmem:[%s4245_s7 + $0x38] sm:$0xff]  }
 0x5e8   : > { %v1730_v58 = vpop.f32.mrb[10].mxu0  ;;  %3126 = vmatpush3.bf16.msra.mxu0 %v3365_v43  ;;  %v2919_v43 = vld [vmem:[%s4727_s26] ss:$0 sm:$0xff] }
 0x5e9   : > { %v1502_v59 = vpop.f32.mrb[12].mxu1  ;;  %v3114_v60 = vpop.f32.mrb[11].mxu0  ;;  %v1734_v4 = vadd.f32 %v1733_v61, %v4415_v13  ;;  %3127 = vmatprep.subr.bf16.mxu0 %v3784_v24 }
 0x5ea   : > { %v1508_v62 = vmul.f32 0.17677669, %v1502_v59  ;;  %v3089_v63 = vpop.f32.mrb[13].mxu1 }
 0x5eb   : > { %v1505_v0 = vpop.f32.mrb[14].mxu1  ;;  %v1735_v5 = vsel %vm1396_vm3, %v1734_v4, -inf }
 0x5ec   : > { %v3090_v1 = vpop.f32.mrb[15].mxu1  ;;  %v1509_v2 = vadd.f32 %v1508_v62, %v4415_v13  ;;  %3128 = vmatpush3.bf16.msra.mxu0 %v3366_v45 }
 0x5ed   : > { %3129 = vmatprep.subr.bf16.mxu0 %v3784_v24 }
 0x5ee   : > { %v1510_v3 = vsel %vm1396_vm3, %v1509_v2, -inf }
 0x5ef   : > { %1511 = vmax.xlane.f32.xlu1 %v1510_v3 }
 0x5f0   : > { %3130 = vmatpush3.bf16.msra.mxu0 %v3367_v47 }
 0x5f1   : > { %3131 = vmatprep.subr.bf16.mxu0 %v3784_v24 }
 0x5f3   : > { %1736 = vmax.xlane.f32.xlu1 %v1735_v5 }
 0x671   : > { %v1625_v6 = vpop.xlane.xlu0 %1624 }
 0x672   : > { %v1626_v8 = vsub.f32 %v1622_v48, %v1625_v6  ;;  %v3369_v48 = vld [vmem:[%s4245_s7 + $0x30] sm:$0xff]  }
 0x674   : > { %v1627_v9 = vmul.f32 1.442695, %v1626_v8  ;;  %v3371_v8 = vld [vmem:[%s4304_s12] ss:$8 sps:$4 sm:$0xff]  }
 0x676   : > { %3415 = vpow2.f32 %v1627_v9  ;;  %v3373_v9 = vld [vmem:[%s4304_s12 + $0x4] ss:$8 sps:$4 sm:$0xff]  }
 0x67c   : > { %v1512_v10 = vpop.xlane.xlu1 %1511 }
 0x67d   : > { %v1513_v11 = vsub.f32 %v1509_v2, %v1512_v10  ;;  %v2909_v10 = vld [vmem:[%s4723_s27] ss:$0 sm:$0xff] }
 0x67f   : > { %v1514_v17 = vmul.f32 1.442695, %v1513_v11 }
 0x680   : > { %v3416_v12 = vpop.eup %3415  ;;  %v1737_v14 = vpop.xlane.xlu1 %1736 }
 0x681   : > { %v1738_v15 = vsub.f32 %v1734_v4, %v1737_v14  ;;  %v1629_v16 = vsel %vm1396_vm3, %v3416_v12, 0.0 }
 0x682   : > { %1630 = vadd.xlane.f32.xlu0 %v1629_v16 }
 0x683   : > { %v1739_v18 = vmul.f32 1.442695, %v1738_v15 }
 0x685   : > { %3417 = vpow2.f32 %v1739_v18  ;;  %v3376_v18 = vld [vmem:[%s4304_s12 + $0x14] ss:$8 sps:$4 sm:$0xff]  }
 0x686   : > { %3419 = vpow2.f32 %v1514_v17 }
 0x68f   : > { %v3418_v13 = vpop.eup %3417 }
 0x690   : > { %v1741_v19 = vsel %vm1396_vm3, %v3418_v13, 0.0  ;;  %v3420_v20 = vpop.eup %3419 }
 0x691   : > { %1742 = vadd.xlane.f32.xlu1 %v1741_v19  ;;  %v1516_v21 = vsel %vm1396_vm3, %v3420_v20, 0.0  ;;  %v3379_v19 = vld [vmem:[%s4304_s12 + $0x24] ss:$8 sps:$4 sm:$0xff]  }
 0x695   : > { %1517 = vadd.xlane.f32.xlu1 %v1516_v21  ;;  %v3380_v21 = vld [vmem:[%s4304_s12 + $0x30] ss:$8 sps:$4 sm:$0xff]  }
 0x698   : > { %1523 = vrot.lane.b32.xlu0 %v4404_v7, %s3786_s16 }
 0x6a6   : > { %1635 = vrot.lane.b32.xlu1 %v4404_v7, %s3787_s21 }
 0x6aa   : > { %1747 = vrot.lane.b32.xlu1 %v4404_v7, %s3788_s11 }
 0x70f   : > { %v1631_v22 = vpop.xlane.xlu0 %1630 }
 0x713   : > { %v1524_v25 = vpop.permute.xlu0 %1523 }
 0x714   : > { %v1529_v26 = vsel %vm1412_vm2, %v1524_v25, 0  ;;  %v3383_v25 = vld [vmem:[%s4304_s12 + $0x40] ss:$8 sps:$4 sm:$0xff]  }
 0x715   : > { %3092 = vmatpush3.bf16.msra.mxu1 %v1529_v26  ;;  %v3388_v26 = vld [vmem:[%s4304_s12 + $0x54] ss:$8 sps:$4 sm:$0xff]  }
 0x716   : > { %3103 = vmatprep.subr.bf16.mxu1 %v3784_v24 }
 0x71e   : > { %v1743_v27 = vpop.xlane.xlu1 %1742 }
 0x722   : > { %v1518_v28 = vpop.xlane.xlu1 %1517 }
 0x723   : > { %3421 = vrcp.f32 %v1518_v28  ;;  %v3391_v28 = vld [vmem:[%s4304_s12 + $0x64] ss:$8 sps:$4 sm:$0xff]  }
 0x724   : > { %3423 = vrcp.f32 %v1631_v22  ;;  %v3385_v22 = vld [vmem:[%s4304_s12 + $0x44] ss:$8 sps:$4 sm:$0xff]  }
 0x725   : > { %3425 = vrcp.f32 %v1743_v27  ;;  %v3386_v27 = vld [vmem:[%s4304_s12 + $0x50] ss:$8 sps:$4 sm:$0xff]  }
 0x726   : > { %v1636_v31 = vpop.permute.xlu1 %1635 }
 0x727   : > { %v1641_v34 = vsel %vm1412_vm2, %v1636_v31, 0  ;;  %v3392_v31 = vld [vmem:[%s4304_s12 + $0x70] ss:$8 sps:$4 sm:$0xff]  }
 0x72a   : > { %v1748_v35 = vpop.permute.xlu1 %1747 }
 0x72b   : > { %v1753_v38 = vsel %vm1412_vm2, %v1748_v35, 0 }
 0x72d   : > { %v3422_v29 = vpop.eup %3421 }
 0x72e   : > { %v1520_v30 = vmul.f32 %v3422_v29, %v3420_v20  ;;  %v3424_v33 = vpop.eup %3423  ;;  %v3377_v20 = vld [vmem:[%s4304_s12 + $0x20] ss:$8 sps:$4 sm:$0xff]  }
 0x72f   : > { %v1633_v7 = vmul.f32 %v3424_v33, %v3416_v12  ;;  %v3426_v37 = vpop.eup %3425  ;;  %v3389_v29 = vld [vmem:[%s4304_s12 + $0x60] ss:$8 sps:$4 sm:$0xff]  }
 0x730   : > { %v1521_v32 = vpack.c.bf16 %v1520_v30, %v1520_v30  ;;  %v1745_v39 = vmul.f32 %v3426_v37, %v3418_v13  ;;  %v3374_v13 = vld [vmem:[%s4304_s12 + $0x10] ss:$8 sps:$4 sm:$0xff]   ;;  %v3394_v30 = vld [vmem:[%s4304_s12 + $0x74] ss:$8 sps:$4 sm:$0xff]  }
 0x731   : > { %v1634_v36 = vpack.c.bf16 %v1633_v7, %v1633_v7 }
 0x732   : > { %3094 = vmatmul.mubr.msk.bf16.vlgmr.msra.gmra.mrb[16].mxu1 %vm1396_vm3, %v1521_v32  ;;  %v1746_v40 = vpack.c.bf16 %v1745_v39, %v1745_v39 }
 0x733   : > { %3104 = vmatpush3.bf16.msra.mxu1 %v1641_v34  ;;  %3105 = vmatprep.mubr.msk.bf16.mxu1 %vm3785_vm0, %v3784_v24 }
 0x734   : > { %3115 = vmatprep.subr.bf16.mxu1 %v3784_v24 }
 0x73a   : > { %3106 = vmatmul.mubr.msk.bf16.vlgmr.msra.gmra.mrb[20].mxu1 %vm1396_vm3, %v1634_v36 }
 0x73b   : > { %3116 = vmatpush3.bf16.msra.mxu1 %v1753_v38  ;;  %3117 = vmatprep.mubr.msk.bf16.mxu1 %vm3785_vm0, %v3784_v24 }
 0x73c   : > { %2065 = vmatprep.subr.bf16.mxu1 %v3373_v9 }
 0x742   : > { %3118 = vmatmul.mubr.msk.bf16.vlgmr.msra.gmra.mrb[24].mxu1 %vm1396_vm3, %v1746_v40 }
 0x743   : > { %2097 = vmatprep.mubr.bf16.mxu1 %v3783_v23  ;;  %v3368_v23 = vld [vmem:[%s4245_s7 + $0x28] sm:$0xff]   ;;  %2066 = vmatpush1.bf16.msra.mxu1 %v3371_v8 }
 0x744   : > { %3132 = vmatpush3.bf16.msra.mxu0 %v3368_v23  ;;  %2067 = vmatprep.subr.bf16.mxu1 %v3376_v18 }
 0x745   : > { %3133 = vmatprep.subr.bf16.mxu0 %v3784_v24 }
 0x747   : > { %2068 = vmatpush1.bf16.msra.mxu1 %v3374_v13 }
 0x748   : > { %3134 = vmatpush3.bf16.msra.mxu0 %v3369_v48  ;;  %2069 = vmatprep.subr.bf16.mxu1 %v3379_v19  ;;  %v3395_v48 = vld [vmem:[%s4247_s4 + $0x40] sm:$0xff]  }
 0x749   : > { %3135 = vmatprep.subr.bf16.mxu0 %v3784_v24 }
 0x74b   : > { %2070 = vmatpush1.bf16.msra.mxu1 %v3377_v20 }
 0x74c   : > { %3136 = vmatpush3.bf16.msra.mxu0 %v3370_v56  ;;  %v3400_v56 = vld [vmem:[%s4247_s4 + $0x10] sm:$0xff]  }
 0x74d   : > { %3013 = vmatprep.subr.bf16.mxu0 %v3395_v48 }
 0x805   : > { %v1565_v49 = vpop.f32.mrb[16].mxu1 }
 0x806   : > { %1796 = vrot.lane.b32.xlu0 %v1565_v49, %s3788_s11  ;;  %v3095_v52 = vpop.f32.mrb[17].mxu1  ;;  %v3396_v49 = vld [vmem:[%s4247_s4] sm:$0xff]  }
 0x807   : > { %v1568_v54 = vpop.f32.mrb[18].mxu1  ;;  %v3397_v52 = vld [vmem:[%s4247_s4 + $0x48] sm:$0xff]  }
 0x808   : > { %v3096_v55 = vpop.f32.mrb[19].mxu1  ;;  %v3398_v54 = vld [vmem:[%s4247_s4 + $0x8] sm:$0xff]  }
 0x809   : > { %v3399_v55 = vld [vmem:[%s4247_s4 + $0x50] sm:$0xff]  }
 0x80d   : > { %v1677_v57 = vpop.f32.mrb[20].mxu1 }
 0x80e   : > { %1800 = vrot.lane.b32.xlu1 %v1677_v57, %s3787_s21  ;;  %v3107_v58 = vpop.f32.mrb[21].mxu1  ;;  %v3401_v57 = vld [vmem:[%s4247_s4 + $0x58] sm:$0xff]   ;;  %s4731_s21 = sld [smem:[#allocation24_spill]] }
 0x80f   : > { %v1680_v59 = vpop.f32.mrb[22].mxu1  ;;  %v3402_v58 = vld [vmem:[%s4247_s4 + $0x18] sm:$0xff]  }
 0x810   : > { %v3108_v60 = vpop.f32.mrb[23].mxu1  ;;  %v3403_v59 = vld [vmem:[%s4247_s4 + $0x60] sm:$0xff]  }
 0x811   : > { %v3404_v60 = vld [vmem:[%s4247_s4 + $0x20] sm:$0xff]  }
 0x814   : > { %p2955_p4 = scmp.ne.s32.totalorder %s4731_s21, 1 }
 0x815   : > { %v1789_v61 = vpop.f32.mrb[24].mxu1  ;;  %vm3790_vm6 = vmmov (!%p2955_p4), 0  }
 0x816   : > { %1804 = vrot.lane.b32.xlu0 %v1789_v61, %s3786_s16  ;;  %v3119_v62 = vpop.f32.mrb[25].mxu1  ;;  %v3405_v61 = vld [vmem:[%s4247_s4 + $0x68] sm:$0xff]  }
 0x817   : > { %v1792_v63 = vpop.f32.mrb[26].mxu1  ;;  %v3406_v62 = vld [vmem:[%s4247_s4 + $0x28] sm:$0xff]  }
 0x818   : > { %v3120_v0 = vpop.f32.mrb[27].mxu1  ;;  %v3407_v63 = vld [vmem:[%s4247_s4 + $0x70] sm:$0xff]  }
 0x819   : > { %v3408_v0 = vld [vmem:[%s4247_s4 + $0x30] sm:$0xff]  }
 0x878   : > { %v1797_v1 = vpop.permute.xlu0 %1796 }
 0x879   : > { %v1807_v2 = vsel %vm1341_vm1, %v4439_v46, %v1797_v1  ;;  %v3409_v1 = vld [vmem:[%s4247_s4 + $0x78] sm:$0xff]  }
 0x880   : > { %v1801_v24 = vpop.permute.xlu1 %1800 }
 0x881   : > { %v1809_v3 = vsel %vm1808_vm4, %v1807_v2, %v1801_v24  ;;  %v3410_v24 = vld [vmem:[%s4247_s4 + $0x38] sm:$0xff]   ;;  %v1973_v2 = vld [vmem:[%s4309_s22] sm:$0x3] }
 0x888   : > { %v1805_v4 = vpop.permute.xlu0 %1804 }
 0x889   : > { %v1811_v5 = vsel %vm1810_vm5, %v1809_v3, %v1805_v4  ;;  %v1978_v3 = vrot.slane %v1973_v2, %v4388_v53  ;;  %v1982_v4 = vrot.slane %v1973_v2, %v1117_v51  ;;  %v3441_v2 = vld [vmem:[#allocation10 + $0x30] sm:$0xff] (!%p2955_p4)  }
 0x88a   : > { %v1812_v6 = vpack.c.bf16 %v1811_v5, %v1811_v5 }
 0x88c   : > { %3138 = vmatmul.mubr.bf16.vlgmr.msra.gmra.mrb[12].mxu0 %v1812_v6 }
 0x88d   : > { %3014 = vmatpush3.bf16.msra.mxu0 %v3396_v49 }
 0x88e   : > { %3015 = vmatprep.subr.bf16.mxu0 %v3397_v52  ;;  %v2954_v52 = vld [vmem:[%s1022_s1] ss:$0 sm:$0xff] }
 0x891   : > { %3016 = vmatpush3.bf16.msra.mxu0 %v3398_v54 }
 0x892   : > { %3017 = vmatprep.subr.bf16.mxu0 %v3399_v55 }
 0x895   : > { %3018 = vmatpush3.bf16.msra.mxu0 %v3400_v56  ;;  %v3435_v56 = vld [vmem:[#allocation10] sm:$0xff] (!%p2955_p4)  }
 0x896   : > { %3019 = vmatprep.subr.bf16.mxu0 %v3401_v57  ;;  %v3789_v57 = vmov (!%p2955_p4), 0.0  }
 0x899   : > { %3020 = vmatpush3.bf16.msra.mxu0 %v3402_v58  ;;  %v3436_v58 = vld [vmem:[#allocation10 + $0x8] sm:$0xff] (!%p2955_p4)  }
 0x89a   : > { %3021 = vmatprep.subr.bf16.mxu0 %v3403_v59  ;;  %v3437_v59 = vld [vmem:[#allocation10 + $0x10] sm:$0xff] (!%p2955_p4)  }
 0x89d   : > { %3022 = vmatpush3.bf16.msra.mxu0 %v3404_v60  ;;  %v3443_v60 = vld [vmem:[#allocation13] sm:$0xff] (!%p2955_p4)  }
 0x89e   : > { %3023 = vmatprep.subr.bf16.mxu0 %v3405_v61  ;;  %v3438_v61 = vld [vmem:[#allocation10 + $0x18] sm:$0xff] (!%p2955_p4)  }
 0x8a1   : > { %3024 = vmatpush3.bf16.msra.mxu0 %v3406_v62  ;;  %v3444_v62 = vld [vmem:[#allocation13 + $0x8] sm:$0xff] (!%p2955_p4)  }
 0x8a2   : > { %3025 = vmatprep.subr.bf16.mxu0 %v3407_v63  ;;  %v3439_v63 = vld [vmem:[#allocation10 + $0x20] sm:$0xff] (!%p2955_p4)  }
 0x8a5   : > { %3026 = vmatpush3.bf16.msra.mxu0 %v3408_v0  ;;  %v3445_v0 = vld [vmem:[#allocation13 + $0x10] sm:$0xff] (!%p2955_p4)  }
 0x8a6   : > { %3027 = vmatprep.subr.bf16.mxu0 %v3409_v1  ;;  %v3440_v1 = vld [vmem:[#allocation10 + $0x28] sm:$0xff] (!%p2955_p4)  }
 0x8a9   : > { %3028 = vmatpush3.bf16.msra.mxu0 %v3410_v24  ;;  %v3446_v24 = vld [vmem:[#allocation13 + $0x18] sm:$0xff] (!%p2955_p4)  }
 0x8aa   : > { %3141 = vmatprep.subr.bf16.mxu0 (!%p2955_p4), %v3789_v57 }
 0x95f   : > { %v1918_v11 = vpop.f32.mrb[12].mxu0 }
 0x960   : > { %v1919_v46 = vadd.f32 %v2909_v10, %v1918_v11  ;;  %v3139_v12 = vpop.f32.mrb[13].mxu0 }
 0x961   : > { %v1921_v14 = vpop.f32.mrb[14].mxu0 }
 0x962   : > { %v1924_v15 = vadd.f32 %v1919_v46, %v4364_v44  ;;  %v3140_v16 = vpop.f32.mrb[15].mxu0  ;;  %v3382_v44 = vld [vmem:[%s4304_s12 + $0x34] ss:$8 sps:$4 sm:$0xff]  }
 0x963   : > { %2071 = vmatprep.subr.bf16.mxu1 %v3382_v44 }
 0x964   : > { %1927 = vadd.xlane.f32.xlu1 %v1924_v15  ;;  %v1931_v17 = vmul.f32 %v1924_v15, %v1924_v15  ;;  %2072 = vmatpush1.bf16.msra.mxu1 %v3380_v21 }
 0x965   : > { %2073 = vmatprep.subr.bf16.mxu1 %v3385_v22 }
 0x966   : > { %1932 = vadd.xlane.f32.xlu0 %v1931_v17 }
 0x968   : > { %2074 = vmatpush1.bf16.msra.mxu1 %v3383_v25 }
 0x969   : > { %2075 = vmatprep.subr.bf16.mxu1 %v3388_v26 }
 0x96c   : > { %2076 = vmatpush1.bf16.msra.mxu1 %v3386_v27 }
 0x96d   : > { %2077 = vmatprep.subr.bf16.mxu1 %v3391_v28 }
 0x970   : > { %2078 = vmatpush1.bf16.msra.mxu1 %v3389_v29 }
 0x971   : > { %2079 = vmatprep.subr.bf16.mxu1 %v3394_v30  ;;  %v2936_v30 = vld [vmem:[%s1016_s18] ss:$0 sm:$0xff] }
 0x974   : > { %2080 = vmatpush1.bf16.msra.mxu1 %v3392_v31 }
 0x975   : > { %3161 = vmatprep.subr.bf16.mxu1 (!%p2955_p4), %v3789_v57 }
 0x9f1   : > { %v1928_v32 = vpop.xlane.xlu1 %1927 }
 0x9f2   : > { %v1930_v33 = vmul.f32 0.0078125, %v1928_v32 }
 0x9f3   : > { %v1933_v34 = vpop.xlane.xlu0 %1932 }
 0x9f4   : > { %v1935_v7 = vmul.f32 %v1930_v33, %v1930_v33  ;;  %v1934_v35 = vmul.f32 0.0078125, %v1933_v34  ;;  %v1938_v39 = vsub.f32 %v1924_v15, %v1930_v33 }
 0x9f6   : > { %v1936_v36 = vsub.f32 %v1934_v35, %v1935_v7 }
 0x9f8   : > { %v1937_v37 = vmax.f32 %v1936_v36, 0.0 }
 0x9fa   : > { %v1939_v38 = vadd.f32 1e-12, %v1937_v37 }
 0x9fc   : > { %3427 = vrsqrt.f32 %v1939_v38 }
 0xa06   : > { %v3428_v40 = vpop.eup %3427 }
 0xa07   : > { %v1941_v42 = vmul.f32 %v3428_v40, %v1938_v39 }
 0xa09   : > { %v1948_v45 = vmul.f32 %v2918_v41, %v1941_v42 }
 0xa0b   : > { %v4521_v47 = vadd.f32 %v2919_v43, %v1948_v45 }
 0xa0d   : > { %v1956_v23 = vpack.c.bf16 %v4521_v47, %v4521_v47 }
 0xa0f   : > { %2098 = vmatmul.mubr.bf16.vlgmr.msra.gmra.mrb[28].mxu1 %v1956_v23 }
 0xa10   : > { %3177 = vmatprep.mubr.msk.bf16.mxu1 (!%p2955_p4), %vm3790_vm6, %v3789_v57  ;;  %3162 = vmatpush3.bf16.msra.mxu1 (!%p2955_p4), %v3443_v60 }
 0xa11   : > { %3163 = vmatprep.subr.bf16.mxu1 (!%p2955_p4), %v3789_v57 }
 0xa14   : > { %3164 = vmatpush3.bf16.msra.mxu1 (!%p2955_p4), %v3444_v62 }
 0xa15   : > { %3165 = vmatprep.subr.bf16.mxu1 (!%p2955_p4), %v3789_v57 }
 0xa18   : > { %3166 = vmatpush3.bf16.msra.mxu1 (!%p2955_p4), %v3445_v0 }
 0xa19   : > { %3167 = vmatprep.subr.bf16.mxu1 (!%p2955_p4), %v3789_v57 }
 0xa1c   : > { %3168 = vmatpush3.bf16.msra.mxu1 (!%p2955_p4), %v3446_v24 }
 0xa1d   : > { %3169 = vmatprep.subr.bf16.mxu1 (!%p2955_p4), %v3789_v57 }
 0xae2   : > { %v2099_v5 = vpop.f32.mrb[28].mxu1 }
 0xae3   : > { %v2100_v6 = vadd.f32 %v2099_v5, %v1978_v3  ;;  %v2101_v8 = vpop.f32.mrb[29].mxu1  ;;  %v3442_v3 = vld [vmem:[#allocation10 + $0x38] sm:$0xff] (!%p2955_p4)   ;;  %v3447_v5 = vld [vmem:[#allocation13 + $0x20] sm:$0xff] (!%p2955_p4)  }
 0xae4   : > { %v2102_v9 = vadd.f32 %v2101_v8, %v1982_v4  ;;  %v2103_v10 = vpop.f32.mrb[30].mxu1  ;;  %3170 = vmatpush3.bf16.msra.mxu1 (!%p2955_p4), %v3447_v5  ;;  %v3449_v8 = vld [vmem:[#allocation13 + $0x30] sm:$0xff] (!%p2955_p4)  }
 0xae5   : > { %v2106_v11 = vmul.f32 %v2100_v6, %v2100_v6  ;;  %v2104_v46 = vpop.f32.mrb[31].mxu1  ;;  %3171 = vmatprep.subr.bf16.mxu1 (!%p2955_p4), %v3789_v57  ;;  %v2956_v10 = vld [vmem:[#allocation11] ss:$0 sm:$0xff] (!%p2955_p4) }
 0xae6   : > { %v2107_v12 = vmul.f32 %v2102_v9, %v2102_v9 }
 0xae7   : > { %v2108_v14 = vmul.f32 %v2106_v11, %v2100_v6 }
 0xae8   : > { %v2109_v15 = vmul.f32 %v2107_v12, %v2102_v9 }
 0xae9   : > { %v2110_v16 = vmul.f32 0.044715, %v2108_v14 }
 0xaea   : > { %v2111_v17 = vmul.f32 0.044715, %v2109_v15 }
 0xaeb   : > { %v2112_v18 = vadd.f32 %v2110_v16, %v2100_v6 }
 0xaec   : > { %v2113_v13 = vadd.f32 %v2111_v17, %v2102_v9 }
 0xaed   : > { %v2114_v19 = vmul.f32 0.7978846, %v2112_v18  ;;  %v2965_v18 = vld [vmem:[#allocation14] ss:$0 sm:$0xff] (!%p2955_p4) }
 0xaee   : > { %v2115_v20 = vmul.f32 0.7978846, %v2113_v13 }
 0xaef   : > { %3429 = vtanh.f32 %v2114_v19 }
 0xaf0   : > { %3431 = vtanh.f32 %v2115_v20 }
 0xaf9   : > { %v3430_v50 = vpop.eup %3429 }
 0xafa   : > { %v3432_v51 = vpop.eup %3431  ;;  %v2118_v53 = vadd.f32 1.0, %v3430_v50 }
 0xafb   : > { %v2119_v44 = vadd.f32 1.0, %v3432_v51 }
 0xafc   : > { %v2120_v21 = vmul.f32 0.5, %v2118_v53 }
 0xafd   : > { %v2121_v22 = vmul.f32 0.5, %v2119_v44 }
 0xafe   : > { %v2122_v25 = vmul.f32 %v2120_v21, %v2100_v6  ;;  %v3448_v6 = vld [vmem:[#allocation13 + $0x28] sm:$0xff] (!%p2955_p4)  }
 0xaff   : > { %v2123_v26 = vmul.f32 %v2121_v22, %v2102_v9  ;;  %3172 = vmatpush3.bf16.msra.mxu1 (!%p2955_p4), %v3448_v6  ;;  %v3450_v9 = vld [vmem:[#allocation13 + $0x38] sm:$0xff] (!%p2955_p4)  }
 0xb00   : > { %v2124_v28 = vpack.c.bf16 %v2122_v25, %v2122_v25  ;;  %3173 = vmatprep.subr.bf16.mxu1 (!%p2955_p4), %v3789_v57 }
 0xb01   : > { %v2125_v27 = vpack.c.bf16 %v2123_v26, %v2123_v26 }
 0xb03   : > { %2293 = vmatprep.mubr.bf16.mxu0 %v2125_v27  ;;  %3174 = vmatpush3.bf16.msra.mxu1 (!%p2955_p4), %v3449_v8 }
 0xb04   : > { %2294 = vmatmul.mubr.bf16.vlgmr.msra.gmra.mrb[16].mxu0 %v2124_v28  ;;  %3175 = vmatprep.subr.bf16.mxu1 (!%p2955_p4), %v3789_v57 }
 0xb05   : > { %3142 = vmatpush3.bf16.msra.mxu0 (!%p2955_p4), %v3435_v56  ;;  %3157 = vmatprep.mubr.msk.bf16.mxu0 (!%p2955_p4), %vm3790_vm6, %v3789_v57 }
 0xb06   : > { %3143 = vmatprep.subr.bf16.mxu0 (!%p2955_p4), %v3789_v57 }
 0xb07   : > { %3176 = vmatpush3.bf16.msra.mxu1 (!%p2955_p4), %v3450_v9 }
 0xb09   : > { %3144 = vmatpush3.bf16.msra.mxu0 (!%p2955_p4), %v3436_v58 }
 0xb0a   : > { %3145 = vmatprep.subr.bf16.mxu0 (!%p2955_p4), %v3789_v57 }
 0xb0d   : > { %3146 = vmatpush3.bf16.msra.mxu0 (!%p2955_p4), %v3437_v59 }
 0xb0e   : > { %3147 = vmatprep.subr.bf16.mxu0 (!%p2955_p4), %v3789_v57 }
 0xb11   : > { %3148 = vmatpush3.bf16.msra.mxu0 (!%p2955_p4), %v3438_v61 }
 0xb12   : > { %3149 = vmatprep.subr.bf16.mxu0 (!%p2955_p4), %v3789_v57 }
 0xb15   : > { %3150 = vmatpush3.bf16.msra.mxu0 (!%p2955_p4), %v3439_v63 }
 0xb16   : > { %3151 = vmatprep.subr.bf16.mxu0 (!%p2955_p4), %v3789_v57 }
 0xb19   : > { %3152 = vmatpush3.bf16.msra.mxu0 (!%p2955_p4), %v3440_v1 }
 0xb1a   : > { %3153 = vmatprep.subr.bf16.mxu0 (!%p2955_p4), %v3789_v57 }
 0xb1d   : > { %3154 = vmatpush3.bf16.msra.mxu0 (!%p2955_p4), %v3441_v2 }
 0xb1e   : > { %3155 = vmatprep.subr.bf16.mxu0 (!%p2955_p4), %v3789_v57 }
 0xb21   : > { %3156 = vmatpush3.bf16.msra.mxu0 (!%p2955_p4), %v3442_v3 }
 0xbd7   : > { %v3029_v29 = vpop.f32.mrb[16].mxu0 }
 0xbd8   : > { %v3030_v31 = vpop.f32.mrb[17].mxu0 }
 0xbd9   : > { %v3031_v32 = vadd.f32 %v3030_v31, %v3029_v29  ;;  %v3032_v33 = vpop.f32.mrb[18].mxu0 }
 0xbda   : > { %v3033_v34 = vpop.f32.mrb[19].mxu0 }
 0xbdb   : > { %v2296_v7 = vadd.f32 %v3031_v32, %v2936_v30 }
 0xbdd   : > { %v2301_v35 = vadd.f32 %v2296_v7, %v4521_v47  ;;  %v2953_v47 = vld [vmem:[%s1019_s6] ss:$0 sm:$0xff] }
 0xbdf   : > { %2304 = vadd.xlane.f32.xlu0 %v2301_v35  ;;  %v2307_v36 = vmul.f32 %v2301_v35, %v2301_v35 }
 0xbe1   : > { %2308 = vadd.xlane.f32.xlu1 %v2307_v36 }
 0xc6c   : > { %v2305_v37 = vpop.xlane.xlu0 %2304 }
 0xc6d   : > { %v2306_v38 = vmul.f32 0.0078125, %v2305_v37 }
 0xc6e   : > { %v2309_v39 = vpop.xlane.xlu1 %2308 }
 0xc6f   : > { %v2311_v40 = vmul.f32 %v2306_v38, %v2306_v38  ;;  %v2310_v41 = vmul.f32 0.0078125, %v2309_v39  ;;  %v2314_v23 = vsub.f32 %v2301_v35, %v2306_v38 }
 0xc71   : > { %v2312_v42 = vsub.f32 %v2310_v41, %v2311_v40 }
 0xc73   : > { %v2313_v43 = vmax.f32 %v2312_v42, 0.0 }
 0xc75   : > { %v2315_v45 = vadd.f32 1e-12, %v2313_v43 }
 0xc77   : > { %3433 = vrsqrt.f32 %v2315_v45 }
 0xc81   : > { %v3434_v48 = vpop.eup %3433 }
 0xc82   : > { %v2317_v49 = vmul.f32 %v3434_v48, %v2314_v23  ;;  %2336 = sbr.rel (%p2955_p4) target bundleno = 3652 (0xe44), region = 148 }
 0xc84   : > { %v2324_v54 = vmul.f32 %v2953_v47, %v2317_v49 }
 0xc86   : > { %v2331_v55 = vadd.f32 %v2954_v52, %v2324_v54 }
 0xc88   : > { %2332 = vst [vmem:[#allocation2] sm:$0xff] %v2331_v55  ;;  %v2337_v4 = vpack.c.bf16 (!%p2955_p4), %v2331_v55, %v2331_v55 }
 0xc8a   : > { %3158 = vmatmul.mubr.bf16.vlgmr.msra.gmra.mrb[0].mxu0 %v2337_v4 }
 0xd5d   : > { %v2443_v11 = vpop.f32.mrb[0].mxu0 }
 0xd5e   : > { %v2444_v46 = vadd.f32 %v2956_v10, %v2443_v11  ;;  %v3159_v12 = vpop.f32.mrb[1].mxu0 }
 0xd5f   : > { %v2446_v14 = vpop.f32.mrb[2].mxu0 }
 0xd60   : > { %3451 = vtanh.f32 %v2444_v46  ;;  %v3160_v15 = vpop.f32.mrb[3].mxu0 }
 0xd6a   : > { %v3452_v16 = vpop.eup %3451 }
 0xd6b   : > { %v2450_v17 = vpack.c.bf16 %v3452_v16, %v3452_v16 }
 0xd6d   : > { %3178 = vmatmul.mubr.bf16.vlgmr.msra.gmra.mrb[0].mxu1 %v2450_v17 }
 0xe40   : > { %v2556_v13 = vpop.f32.mrb[0].mxu1 }
 0xe41   : > { %v2557_v19 = vadd.f32 %v2965_v18, %v2556_v13  ;;  %v3179_v20 = vpop.f32.mrb[1].mxu1 }
 0xe42   : > { %v2559_v50 = vpop.f32.mrb[2].mxu1 }
 0xe43   : > { %2562 = vst [vmem:[%s4326_s13] sm:$0xff] %v2557_v19  ;;  %v3180_v51 = vpop.f32.mrb[3].mxu1 }
 0xe44 PF: > { %s4732_s1 = sld [smem:[#allocation28_spill]]  ;;  %s4733_s3 = sld [smem:[#allocation22_spill]] }
 0xe45   : > { %s4734_s28 = sld [smem:[#allocation23_spill]]  ;;  %s4735_s29 = sld [smem:[#allocation31_spill]] }
 0xe46   : > { %s4736_s30 = sld [smem:[#allocation26_spill]]  ;;  %s4737_s4 = sld [smem:[#allocation27_spill]] }
 0xe47   : > { %s4738_s0 = sld [smem:[#allocation29_spill]]  ;;  %s4739_s23 = sld [smem:[#allocation30_spill]] }
 0xe4a   : > { %s41_s1 = sadd.s32 1, %s4732_s1  }
 0xe4b   : > { %p38_p3 = scmp.ge.s32.totalorder %s41_s1, 6  }
 0xe4d   :  { %40 = sbr.rel (!%p38_p3) target bundleno = 34 (0x22), region = 234 }
 0xe54   :  { %2582 = vsyncpa [#allocation4], 1 }
 0xe55   :  { %2584 = vsyncpa [#allocation4 + $0x1], 1 }
 0xe56   :  { %2585 = vsyncpa [#allocation6], 1 }
 0xe57   :  { %2587 = vsyncpa [#allocation6 + $0x1], 1 }
 0xe58   :  { %2588 = vsyncpa [#allocation9], 1 }
 0xe59   :  { %2590 = vsyncpa [#allocation9 + $0x1], 1 }
 0xe5a   :  { %2591 = vsyncpa [#allocation12], 1 }
 0xe5b   :  { %2592 = vsyncpa [#allocation15], 1 }

</bundles_post_ra>
